<compile_context>
chip_gen: v7x
topology: tpu7x:2x2x1
jax: 0.10.0
libtpu: 0.0.40
codegen_flags: <defaults>
</compile_context>

<pallas_src>
import jax
import jax.numpy as jnp
import numpy as np
from jax.experimental import pallas as pl
from jax.experimental.pallas import tpu as pltpu

EPS = 1e-5


def _down_kernel(x_ref, w1_ref, g1_ref, b1_ref, w2_ref, g2_ref, b2_ref,
                 o_ref, col1_ref, col2_ref, h_ref):
    """Fused (pooled-input) double (conv3x3 -> BN -> ReLU) kernel.

    x_ref   : (N, Hp, Wp, Cin)   pooled activations, NHWC.
    w1_ref  : (9*Cin,  Cmid)     conv1 weight, rows flattened over (ky,kx,ci).
    w2_ref  : (9*Cmid, Cout)     conv2 weight, same layout.
    g*/b*   : (1, C)             BN gamma / beta.
    o_ref   : (Cout, N*Hp*Wp)    lane-dense output slab.
    col1/2  : (N, Hp, Wp, 9*C)   im2col column buffers (scratch).
    h_ref   : (N, Hp, Wp, Cmid)  intermediate activation (scratch).
    """
    N, Hp, Wp, Cin = x_ref.shape
    Cmid = w1_ref.shape[1]
    rows = N * Hp * Wp

    # Zero the im2col buffers once.  Only the 1-px halo strips strictly need
    # it (interiors are fully overwritten below); a single full zero is a
    # handful of vector stores and keeps the code simple.
    col1_ref[...] = jnp.zeros_like(col1_ref)
    col2_ref[...] = jnp.zeros_like(col2_ref)

    def scatter_taps(src_ref, col_ref, c):
        """Write the 9 shifted 3x3 taps of src (N,Hp,Wp,c) into the column
        buffer's lane blocks [t*c, (t+1)*c), t = ky*3+kx, matching the
        (ky,kx,ci)-flattened weight rows.  Un-written halo strips stay zero,
        which implements the 'same' padding."""
        for ky in range(3):
            dy = ky - 1
            oy0, oy1 = max(0, -dy), Hp - max(0, dy)
            sy0, sy1 = oy0 + dy, oy1 + dy
            for kx in range(3):
                dx = kx - 1
                ox0, ox1 = max(0, -dx), Wp - max(0, dx)
                sx0, sx1 = ox0 + dx, ox1 + dx
                t = ky * 3 + kx
                col_ref[:, oy0:oy1, ox0:ox1, t * c:(t + 1) * c] = (
                    src_ref[:, sy0:sy1, sx0:sx1, :])

    def bn_relu(y2d, gamma, beta):
        """Training-mode BatchNorm (one-pass batch stats, biased var) + ReLU."""
        inv_n = 1.0 / y2d.shape[0]
        s1 = jnp.sum(y2d, axis=0, keepdims=True)
        s2 = jnp.sum(y2d * y2d, axis=0, keepdims=True)
        mean = s1 * inv_n
        var = s2 * inv_n - mean * mean
        scale = jax.lax.rsqrt(var + EPS) * gamma
        return jnp.maximum((y2d - mean) * scale + beta, 0.0)

    # ---- conv1: single im2col matmul (K = 9*Cin) -> BN -> ReLU
    scatter_taps(x_ref, col1_ref, Cin)
    p1 = col1_ref[...].reshape(rows, 9 * Cin)
    y1 = jnp.dot(p1, w1_ref[...], preferred_element_type=jnp.float32)
    h1 = bn_relu(y1, g1_ref[...], b1_ref[...])
    h_ref[...] = h1.reshape(N, Hp, Wp, Cmid)

    # ---- conv2: single im2col matmul (K = 9*Cmid) -> BN -> ReLU
    scatter_taps(h_ref, col2_ref, Cmid)
    p2 = col2_ref[...].reshape(rows, 9 * Cmid)
    y2 = jnp.dot(p2, w2_ref[...], preferred_element_type=jnp.float32)
    h2 = bn_relu(y2, g2_ref[...], b2_ref[...])

    # Lane-dense store: (Cout, rows) -- last dim is a multiple of 128 at this
    # size, so the writeback is an unmasked full-lane store.
    o_ref[...] = h2.T.astype(o_ref.dtype)


@jax.jit
def down_pallas(x_nchw, w1_oihw, g1, b1, w2_oihw, g2, b2):
    """`Down.forward` — input/output in NCHW (PyTorch convention)."""
    N, Cin, H, W = x_nchw.shape
    Cmid = w1_oihw.shape[0]
    Cout = w2_oihw.shape[0]
    Hp, Wp = H // 2, W // 2

    # Glue (fused by XLA): NCHW -> NHWC and the 2x2/stride-2 max pool, so the
    # kernel only receives the pooled tensor (4x less input DMA).
    x = jnp.transpose(x_nchw, (0, 2, 3, 1))                       # (N, H, W, C)
    pooled = jnp.max(x.reshape(N, Hp, 2, Wp, 2, Cin), axis=(2, 4))

    # Conv weights OIHW -> flattened (9*Cin, Cout), row index = (ky, kx, ci).
    w1 = jnp.transpose(w1_oihw, (2, 3, 1, 0)).reshape(9 * Cin, Cmid)
    w2 = jnp.transpose(w2_oihw, (2, 3, 1, 0)).reshape(9 * Cmid, Cout)

    vmem = lambda: pl.BlockSpec(memory_space=pltpu.MemorySpace.VMEM)
    out = pl.pallas_call(
        _down_kernel,
        out_shape=jax.ShapeDtypeStruct((Cout, N * Hp * Wp), jnp.float32),
        in_specs=[vmem() for _ in range(7)],
        out_specs=vmem(),
        scratch_shapes=[
            pltpu.VMEM((N, Hp, Wp, 9 * Cin), jnp.float32),    # im2col, conv1
            pltpu.VMEM((N, Hp, Wp, 9 * Cmid), jnp.float32),   # im2col, conv2
            pltpu.VMEM((N, Hp, Wp, Cmid), jnp.float32),       # intermediate h
        ],
    )(pooled, w1, g1.reshape(1, -1), b1.reshape(1, -1),
      w2, g2.reshape(1, -1), b2.reshape(1, -1))

    # (Cout, N*Hp*Wp) -> NCHW, pure glue.
    return jnp.transpose(out.reshape(Cout, N, Hp, Wp), (1, 0, 2, 3))


def _reference_down(x_nchw, w1, g1, b1, w2, g2, b2):
    """Pure-JAX reference mirroring PyTorch MaxPool2d(2) + DoubleConv (train BN)."""
    x = jax.lax.reduce_window(x_nchw, -jnp.inf, jax.lax.max,
                              (1, 1, 2, 2), (1, 1, 2, 2), "VALID")

    def conv_bn_relu(h, w, g, b):
        y = jax.lax.conv_general_dilated(
            h, w, window_strides=(1, 1), padding="SAME",
            dimension_numbers=("NCHW", "OIHW", "NCHW"))
        mean = y.mean(axis=(0, 2, 3), keepdims=True)
        var = ((y - mean) ** 2).mean(axis=(0, 2, 3), keepdims=True)
        yn = (y - mean) / jnp.sqrt(var + EPS)
        yn = yn * g.reshape(1, -1, 1, 1) + b.reshape(1, -1, 1, 1)
        return jnp.maximum(yn, 0.0)

    x = conv_bn_relu(x, w1, g1, b1)
    x = conv_bn_relu(x, w2, g2, b2)
    return x


if __name__ == "__main__":
    # Down(in_channels=4, out_channels=8); mid_channels defaults to out_channels.
    in_channels, out_channels = 4, 8
    mid_channels = out_channels
    N, H, W = 2, 16, 16

    key = jax.random.PRNGKey(0)
    kx, kw1, kw2, kg1, kb1, kg2, kb2 = jax.random.split(key, 7)

    x = jax.random.normal(kx, (N, in_channels, H, W), jnp.float32)
    w1 = 0.1 * jax.random.normal(kw1, (mid_channels, in_channels, 3, 3), jnp.float32)
    w2 = 0.1 * jax.random.normal(kw2, (out_channels, mid_channels, 3, 3), jnp.float32)
    g1 = 1.0 + 0.1 * jax.random.normal(kg1, (mid_channels,), jnp.float32)
    b1 = 0.1 * jax.random.normal(kb1, (mid_channels,), jnp.float32)
    g2 = 1.0 + 0.1 * jax.random.normal(kg2, (out_channels,), jnp.float32)
    b2 = 0.1 * jax.random.normal(kb2, (out_channels,), jnp.float32)

    out = down_pallas(x, w1, g1, b1, w2, g2, b2)
    out = jax.block_until_ready(out)
    assert out.shape == (N, out_channels, H // 2, W // 2)

    ref = jax.block_until_ready(_reference_down(x, w1, g1, b1, w2, g2, b2))
    np.testing.assert_allclose(np.asarray(out), np.asarray(ref),
                               rtol=1e-4, atol=1e-4)

    print("KERNEL_OK")
</pallas_src>

<mosaic_0001>
module attributes {stable_mosaic.version = 11 : i64} {
  func.func @_down_kernel(%arg0: memref<2x8x8x4xf32, #tpu.memory_space<vmem>>, %arg1: memref<36x8xf32, #tpu.memory_space<vmem>>, %arg2: memref<1x8xf32, #tpu.memory_space<vmem>>, %arg3: memref<1x8xf32, #tpu.memory_space<vmem>>, %arg4: memref<72x8xf32, #tpu.memory_space<vmem>>, %arg5: memref<1x8xf32, #tpu.memory_space<vmem>>, %arg6: memref<1x8xf32, #tpu.memory_space<vmem>>, %arg7: memref<8x128xf32, #tpu.memory_space<vmem>>, %arg8: memref<2x8x8x36xf32, #tpu.memory_space<vmem>>, %arg9: memref<2x8x8x72xf32, #tpu.memory_space<vmem>>, %arg10: memref<2x8x8x8xf32, #tpu.memory_space<vmem>>) attributes {dimension_semantics = [], scalar_prefetch = 0 : i64, scratch_operands = 3 : i64, tpu.core_type = #tpu.core_type<tc>} {
    %cst = arith.constant 0.000000e+00 : f32
    %0 = vector.broadcast %cst : f32 to vector<2x8x8x36xf32>
    %c0 = arith.constant 0 : index
    %c0_0 = arith.constant 0 : index
    %c0_1 = arith.constant 0 : index
    %c0_2 = arith.constant 0 : index
    %1 = vector.load %arg8[%c0, %c0_0, %c0_1, %c0_2] : memref<2x8x8x36xf32, #tpu.memory_space<vmem>>, vector<2x8x8x36xf32>
    tpu.vector_store %arg8[%c0, %c0_0, %c0_1, %c0_2], %0 {strides = array<i32>} : memref<2x8x8x36xf32, #tpu.memory_space<vmem>>, vector<2x8x8x36xf32>,
    %cst_3 = arith.constant 0.000000e+00 : f32
    %2 = vector.broadcast %cst_3 : f32 to vector<2x8x8x72xf32>
    %c0_4 = arith.constant 0 : index
    %c0_5 = arith.constant 0 : index
    %c0_6 = arith.constant 0 : index
    %c0_7 = arith.constant 0 : index
    %3 = vector.load %arg9[%c0_4, %c0_5, %c0_6, %c0_7] : memref<2x8x8x72xf32, #tpu.memory_space<vmem>>, vector<2x8x8x72xf32>
    tpu.vector_store %arg9[%c0_4, %c0_5, %c0_6, %c0_7], %2 {strides = array<i32>} : memref<2x8x8x72xf32, #tpu.memory_space<vmem>>, vector<2x8x8x72xf32>,
    %c0_8 = arith.constant 0 : index
    %c0_9 = arith.constant 0 : index
    %c0_10 = arith.constant 0 : index
    %c0_11 = arith.constant 0 : index
    %4 = vector.load %arg0[%c0_8, %c0_9, %c0_10, %c0_11] : memref<2x8x8x4xf32, #tpu.memory_space<vmem>>, vector<2x7x7x4xf32>
    %c0_12 = arith.constant 0 : index
    %c1 = arith.constant 1 : index
    %c1_13 = arith.constant 1 : index
    %c0_14 = arith.constant 0 : index
    %5 = vector.load %arg8[%c0_12, %c1, %c1_13, %c0_14] : memref<2x8x8x36xf32, #tpu.memory_space<vmem>>, vector<2x7x7x4xf32>
    tpu.vector_store %arg8[%c0_12, %c1, %c1_13, %c0_14], %4 {strides = array<i32>} : memref<2x8x8x36xf32, #tpu.memory_space<vmem>>, vector<2x7x7x4xf32>,
    %c0_15 = arith.constant 0 : index
    %c0_16 = arith.constant 0 : index
    %c0_17 = arith.constant 0 : index
    %c0_18 = arith.constant 0 : index
    %6 = vector.load %arg0[%c0_15, %c0_16, %c0_17, %c0_18] : memref<2x8x8x4xf32, #tpu.memory_space<vmem>>, vector<2x7x8x4xf32>
    %c0_19 = arith.constant 0 : index
    %c1_20 = arith.constant 1 : index
    %c0_21 = arith.constant 0 : index
    %c4 = arith.constant 4 : index
    %7 = vector.load %arg8[%c0_19, %c1_20, %c0_21, %c4] : memref<2x8x8x36xf32, #tpu.memory_space<vmem>>, vector<2x7x8x4xf32>
    tpu.vector_store %arg8[%c0_19, %c1_20, %c0_21, %c4], %6 {strides = array<i32>} : memref<2x8x8x36xf32, #tpu.memory_space<vmem>>, vector<2x7x8x4xf32>,
    %c0_22 = arith.constant 0 : index
    %c0_23 = arith.constant 0 : index
    %c1_24 = arith.constant 1 : index
    %c0_25 = arith.constant 0 : index
    %8 = vector.load %arg0[%c0_22, %c0_23, %c1_24, %c0_25] : memref<2x8x8x4xf32, #tpu.memory_space<vmem>>, vector<2x7x7x4xf32>
    %c0_26 = arith.constant 0 : index
    %c1_27 = arith.constant 1 : index
    %c0_28 = arith.constant 0 : index
    %c8 = arith.constant 8 : index
    %9 = vector.load %arg8[%c0_26, %c1_27, %c0_28, %c8] : memref<2x8x8x36xf32, #tpu.memory_space<vmem>>, vector<2x7x7x4xf32>
    tpu.vector_store %arg8[%c0_26, %c1_27, %c0_28, %c8], %8 {strides = array<i32>} : memref<2x8x8x36xf32, #tpu.memory_space<vmem>>, vector<2x7x7x4xf32>,
    %c0_29 = arith.constant 0 : index
    %c0_30 = arith.constant 0 : index
    %c0_31 = arith.constant 0 : index
    %c0_32 = arith.constant 0 : index
    %10 = vector.load %arg0[%c0_29, %c0_30, %c0_31, %c0_32] : memref<2x8x8x4xf32, #tpu.memory_space<vmem>>, vector<2x8x7x4xf32>
    %c0_33 = arith.constant 0 : index
    %c0_34 = arith.constant 0 : index
    %c1_35 = arith.constant 1 : index
    %c12 = arith.constant 12 : index
    %11 = vector.load %arg8[%c0_33, %c0_34, %c1_35, %c12] : memref<2x8x8x36xf32, #tpu.memory_space<vmem>>, vector<2x8x7x4xf32>
    tpu.vector_store %arg8[%c0_33, %c0_34, %c1_35, %c12], %10 {strides = array<i32>} : memref<2x8x8x36xf32, #tpu.memory_space<vmem>>, vector<2x8x7x4xf32>,
    %c0_36 = arith.constant 0 : index
    %c0_37 = arith.constant 0 : index
    %c0_38 = arith.constant 0 : index
    %c0_39 = arith.constant 0 : index
    %12 = vector.load %arg0[%c0_36, %c0_37, %c0_38, %c0_39] : memref<2x8x8x4xf32, #tpu.memory_space<vmem>>, vector<2x8x8x4xf32>
    %c0_40 = arith.constant 0 : index
    %c0_41 = arith.constant 0 : index
    %c0_42 = arith.constant 0 : index
    %c16 = arith.constant 16 : index
    %13 = vector.load %arg8[%c0_40, %c0_41, %c0_42, %c16] : memref<2x8x8x36xf32, #tpu.memory_space<vmem>>, vector<2x8x8x4xf32>
    tpu.vector_store %arg8[%c0_40, %c0_41, %c0_42, %c16], %12 {strides = array<i32>} : memref<2x8x8x36xf32, #tpu.memory_space<vmem>>, vector<2x8x8x4xf32>,
    %c0_43 = arith.constant 0 : index
    %c0_44 = arith.constant 0 : index
    %c1_45 = arith.constant 1 : index
    %c0_46 = arith.constant 0 : index
    %14 = vector.load %arg0[%c0_43, %c0_44, %c1_45, %c0_46] : memref<2x8x8x4xf32, #tpu.memory_space<vmem>>, vector<2x8x7x4xf32>
    %c0_47 = arith.constant 0 : index
    %c0_48 = arith.constant 0 : index
    %c0_49 = arith.constant 0 : index
    %c20 = arith.constant 20 : index
    %15 = vector.load %arg8[%c0_47, %c0_48, %c0_49, %c20] : memref<2x8x8x36xf32, #tpu.memory_space<vmem>>, vector<2x8x7x4xf32>
    tpu.vector_store %arg8[%c0_47, %c0_48, %c0_49, %c20], %14 {strides = array<i32>} : memref<2x8x8x36xf32, #tpu.memory_space<vmem>>, vector<2x8x7x4xf32>,
    %c0_50 = arith.constant 0 : index
    %c1_51 = arith.constant 1 : index
    %c0_52 = arith.constant 0 : index
    %c0_53 = arith.constant 0 : index
    %16 = vector.load %arg0[%c0_50, %c1_51, %c0_52, %c0_53] : memref<2x8x8x4xf32, #tpu.memory_space<vmem>>, vector<2x7x7x4xf32>
    %c0_54 = arith.constant 0 : index
    %c0_55 = arith.constant 0 : index
    %c1_56 = arith.constant 1 : index
    %c24 = arith.constant 24 : index
    %17 = vector.load %arg8[%c0_54, %c0_55, %c1_56, %c24] : memref<2x8x8x36xf32, #tpu.memory_space<vmem>>, vector<2x7x7x4xf32>
    tpu.vector_store %arg8[%c0_54, %c0_55, %c1_56, %c24], %16 {strides = array<i32>} : memref<2x8x8x36xf32, #tpu.memory_space<vmem>>, vector<2x7x7x4xf32>,
    %c0_57 = arith.constant 0 : index
    %c1_58 = arith.constant 1 : index
    %c0_59 = arith.constant 0 : index
    %c0_60 = arith.constant 0 : index
    %18 = vector.load %arg0[%c0_57, %c1_58, %c0_59, %c0_60] : memref<2x8x8x4xf32, #tpu.memory_space<vmem>>, vector<2x7x8x4xf32>
    %c0_61 = arith.constant 0 : index
    %c0_62 = arith.constant 0 : index
    %c0_63 = arith.constant 0 : index
    %c28 = arith.constant 28 : index
    %19 = vector.load %arg8[%c0_61, %c0_62, %c0_63, %c28] : memref<2x8x8x36xf32, #tpu.memory_space<vmem>>, vector<2x7x8x4xf32>
    tpu.vector_store %arg8[%c0_61, %c0_62, %c0_63, %c28], %18 {strides = array<i32>} : memref<2x8x8x36xf32, #tpu.memory_space<vmem>>, vector<2x7x8x4xf32>,
    %c0_64 = arith.constant 0 : index
    %c1_65 = arith.constant 1 : index
    %c1_66 = arith.constant 1 : index
    %c0_67 = arith.constant 0 : index
    %20 = vector.load %arg0[%c0_64, %c1_65, %c1_66, %c0_67] : memref<2x8x8x4xf32, #tpu.memory_space<vmem>>, vector<2x7x7x4xf32>
    %c0_68 = arith.constant 0 : index
    %c0_69 = arith.constant 0 : index
    %c0_70 = arith.constant 0 : index
    %c32 = arith.constant 32 : index
    %21 = vector.load %arg8[%c0_68, %c0_69, %c0_70, %c32] : memref<2x8x8x36xf32, #tpu.memory_space<vmem>>, vector<2x7x7x4xf32>
    tpu.vector_store %arg8[%c0_68, %c0_69, %c0_70, %c32], %20 {strides = array<i32>} : memref<2x8x8x36xf32, #tpu.memory_space<vmem>>, vector<2x7x7x4xf32>,
    %c0_71 = arith.constant 0 : index
    %c0_72 = arith.constant 0 : index
    %c0_73 = arith.constant 0 : index
    %c0_74 = arith.constant 0 : index
    %22 = vector.load %arg8[%c0_71, %c0_72, %c0_73, %c0_74] : memref<2x8x8x36xf32, #tpu.memory_space<vmem>>, vector<2x8x8x36xf32>
    %23 = vector.shape_cast %22 : vector<2x8x8x36xf32> to vector<128x36xf32>
    %c0_75 = arith.constant 0 : index
    %c0_76 = arith.constant 0 : index
    %24 = vector.load %arg1[%c0_75, %c0_76] : memref<36x8xf32, #tpu.memory_space<vmem>>, vector<36x8xf32>
    %cst_77 = arith.constant dense<0.000000e+00> : vector<128x8xf32>
    %25 = tpu.matmul %23, %24, %cst_77 {dimension_numbers = #tpu.dot_dimension_numbers<[1], [0], [0], [1], [0, 0, 1, 1], [], []>} : vector<128x36xf32>, vector<36x8xf32>, vector<128x8xf32> -> vector<128x8xf32>
    %c0_78 = arith.constant 0 : index
    %c0_79 = arith.constant 0 : index
    %26 = vector.load %arg2[%c0_78, %c0_79] : memref<1x8xf32, #tpu.memory_space<vmem>>, vector<1x8xf32>
    %c0_80 = arith.constant 0 : index
    %c0_81 = arith.constant 0 : index
    %27 = vector.load %arg3[%c0_80, %c0_81] : memref<1x8xf32, #tpu.memory_space<vmem>>, vector<1x8xf32>
    %cst_82 = arith.constant dense<0.000000e+00> : vector<8xf32>
    %28 = vector.multi_reduction <add>, %25, %cst_82 [0] : vector<128x8xf32> to vector<8xf32>
    %29 = vector.shape_cast %28 : vector<8xf32> to vector<1x8xf32>
    %30 = arith.mulf %25, %25 : vector<128x8xf32>
    %cst_83 = arith.constant dense<0.000000e+00> : vector<8xf32>
    %31 = vector.multi_reduction <add>, %30, %cst_83 [0] : vector<128x8xf32> to vector<8xf32>
    %32 = vector.shape_cast %31 : vector<8xf32> to vector<1x8xf32>
    %cst_84 = arith.constant 7.812500e-03 : f32
    %33 = vector.broadcast %cst_84 : f32 to vector<1x8xf32>
    %34 = arith.mulf %29, %33 : vector<1x8xf32>
    %cst_85 = arith.constant 7.812500e-03 : f32
    %35 = vector.broadcast %cst_85 : f32 to vector<1x8xf32>
    %36 = arith.mulf %32, %35 : vector<1x8xf32>
    %37 = arith.mulf %34, %34 : vector<1x8xf32>
    %38 = arith.subf %36, %37 : vector<1x8xf32>
    %cst_86 = arith.constant 9.99999974E-6 : f32
    %39 = vector.broadcast %cst_86 : f32 to vector<1x8xf32>
    %40 = arith.addf %38, %39 : vector<1x8xf32>
    %41 = math.rsqrt %40 : vector<1x8xf32>
    %42 = arith.mulf %41, %26 : vector<1x8xf32>
    %43 = vector.broadcast %34 : vector<1x8xf32> to vector<128x8xf32>
    %44 = arith.subf %25, %43 : vector<128x8xf32>
    %45 = vector.broadcast %42 : vector<1x8xf32> to vector<128x8xf32>
    %46 = arith.mulf %44, %45 : vector<128x8xf32>
    %47 = vector.broadcast %27 : vector<1x8xf32> to vector<128x8xf32>
    %48 = arith.addf %46, %47 : vector<128x8xf32>
    %cst_87 = arith.constant 0.000000e+00 : f32
    %49 = vector.broadcast %cst_87 : f32 to vector<128x8xf32>
    %50 = arith.maximumf %48, %49 : vector<128x8xf32>
    %51 = vector.shape_cast %50 : vector<128x8xf32> to vector<2x8x8x8xf32>
    %c0_88 = arith.constant 0 : index
    %c0_89 = arith.constant 0 : index
    %c0_90 = arith.constant 0 : index
    %c0_91 = arith.constant 0 : index
    %52 = vector.load %arg10[%c0_88, %c0_89, %c0_90, %c0_91] : memref<2x8x8x8xf32, #tpu.memory_space<vmem>>, vector<2x8x8x8xf32>
    tpu.vector_store %arg10[%c0_88, %c0_89, %c0_90, %c0_91], %51 {strides = array<i32>} : memref<2x8x8x8xf32, #tpu.memory_space<vmem>>, vector<2x8x8x8xf32>,
    %c0_92 = arith.constant 0 : index
    %c0_93 = arith.constant 0 : index
    %c0_94 = arith.constant 0 : index
    %c0_95 = arith.constant 0 : index
    %53 = vector.load %arg10[%c0_92, %c0_93, %c0_94, %c0_95] : memref<2x8x8x8xf32, #tpu.memory_space<vmem>>, vector<2x7x7x8xf32>
    %c0_96 = arith.constant 0 : index
    %c1_97 = arith.constant 1 : index
    %c1_98 = arith.constant 1 : index
    %c0_99 = arith.constant 0 : index
    %54 = vector.load %arg9[%c0_96, %c1_97, %c1_98, %c0_99] : memref<2x8x8x72xf32, #tpu.memory_space<vmem>>, vector<2x7x7x8xf32>
    tpu.vector_store %arg9[%c0_96, %c1_97, %c1_98, %c0_99], %53 {strides = array<i32>} : memref<2x8x8x72xf32, #tpu.memory_space<vmem>>, vector<2x7x7x8xf32>,
    %c0_100 = arith.constant 0 : index
    %c0_101 = arith.constant 0 : index
    %c0_102 = arith.constant 0 : index
    %c0_103 = arith.constant 0 : index
    %55 = vector.load %arg10[%c0_100, %c0_101, %c0_102, %c0_103] : memref<2x8x8x8xf32, #tpu.memory_space<vmem>>, vector<2x7x8x8xf32>
    %c0_104 = arith.constant 0 : index
    %c1_105 = arith.constant 1 : index
    %c0_106 = arith.constant 0 : index
    %c8_107 = arith.constant 8 : index
    %56 = vector.load %arg9[%c0_104, %c1_105, %c0_106, %c8_107] : memref<2x8x8x72xf32, #tpu.memory_space<vmem>>, vector<2x7x8x8xf32>
    tpu.vector_store %arg9[%c0_104, %c1_105, %c0_106, %c8_107], %55 {strides = array<i32>} : memref<2x8x8x72xf32, #tpu.memory_space<vmem>>, vector<2x7x8x8xf32>,
    %c0_108 = arith.constant 0 : index
    %c0_109 = arith.constant 0 : index
    %c1_110 = arith.constant 1 : index
    %c0_111 = arith.constant 0 : index
    %57 = vector.load %arg10[%c0_108, %c0_109, %c1_110, %c0_111] : memref<2x8x8x8xf32, #tpu.memory_space<vmem>>, vector<2x7x7x8xf32>
    %c0_112 = arith.constant 0 : index
    %c1_113 = arith.constant 1 : index
    %c0_114 = arith.constant 0 : index
    %c16_115 = arith.constant 16 : index
    %58 = vector.load %arg9[%c0_112, %c1_113, %c0_114, %c16_115] : memref<2x8x8x72xf32, #tpu.memory_space<vmem>>, vector<2x7x7x8xf32>
    tpu.vector_store %arg9[%c0_112, %c1_113, %c0_114, %c16_115], %57 {strides = array<i32>} : memref<2x8x8x72xf32, #tpu.memory_space<vmem>>, vector<2x7x7x8xf32>,
    %c0_116 = arith.constant 0 : index
    %c0_117 = arith.constant 0 : index
    %c0_118 = arith.constant 0 : index
    %c0_119 = arith.constant 0 : index
    %59 = vector.load %arg10[%c0_116, %c0_117, %c0_118, %c0_119] : memref<2x8x8x8xf32, #tpu.memory_space<vmem>>, vector<2x8x7x8xf32>
    %c0_120 = arith.constant 0 : index
    %c0_121 = arith.constant 0 : index
    %c1_122 = arith.constant 1 : index
    %c24_123 = arith.constant 24 : index
    %60 = vector.load %arg9[%c0_120, %c0_121, %c1_122, %c24_123] : memref<2x8x8x72xf32, #tpu.memory_space<vmem>>, vector<2x8x7x8xf32>
    tpu.vector_store %arg9[%c0_120, %c0_121, %c1_122, %c24_123], %59 {strides = array<i32>} : memref<2x8x8x72xf32, #tpu.memory_space<vmem>>, vector<2x8x7x8xf32>,
    %c0_124 = arith.constant 0 : index
    %c0_125 = arith.constant 0 : index
    %c0_126 = arith.constant 0 : index
    %c0_127 = arith.constant 0 : index
    %61 = vector.load %arg10[%c0_124, %c0_125, %c0_126, %c0_127] : memref<2x8x8x8xf32, #tpu.memory_space<vmem>>, vector<2x8x8x8xf32>
    %c0_128 = arith.constant 0 : index
    %c0_129 = arith.constant 0 : index
    %c0_130 = arith.constant 0 : index
    %c32_131 = arith.constant 32 : index
    %62 = vector.load %arg9[%c0_128, %c0_129, %c0_130, %c32_131] : memref<2x8x8x72xf32, #tpu.memory_space<vmem>>, vector<2x8x8x8xf32>
    tpu.vector_store %arg9[%c0_128, %c0_129, %c0_130, %c32_131], %61 {strides = array<i32>} : memref<2x8x8x72xf32, #tpu.memory_space<vmem>>, vector<2x8x8x8xf32>,
    %c0_132 = arith.constant 0 : index
    %c0_133 = arith.constant 0 : index
    %c1_134 = arith.constant 1 : index
    %c0_135 = arith.constant 0 : index
    %63 = vector.load %arg10[%c0_132, %c0_133, %c1_134, %c0_135] : memref<2x8x8x8xf32, #tpu.memory_space<vmem>>, vector<2x8x7x8xf32>
    %c0_136 = arith.constant 0 : index
    %c0_137 = arith.constant 0 : index
    %c0_138 = arith.constant 0 : index
    %c40 = arith.constant 40 : index
    %64 = vector.load %arg9[%c0_136, %c0_137, %c0_138, %c40] : memref<2x8x8x72xf32, #tpu.memory_space<vmem>>, vector<2x8x7x8xf32>
    tpu.vector_store %arg9[%c0_136, %c0_137, %c0_138, %c40], %63 {strides = array<i32>} : memref<2x8x8x72xf32, #tpu.memory_space<vmem>>, vector<2x8x7x8xf32>,
    %c0_139 = arith.constant 0 : index
    %c1_140 = arith.constant 1 : index
    %c0_141 = arith.constant 0 : index
    %c0_142 = arith.constant 0 : index
    %65 = vector.load %arg10[%c0_139, %c1_140, %c0_141, %c0_142] : memref<2x8x8x8xf32, #tpu.memory_space<vmem>>, vector<2x7x7x8xf32>
    %c0_143 = arith.constant 0 : index
    %c0_144 = arith.constant 0 : index
    %c1_145 = arith.constant 1 : index
    %c48 = arith.constant 48 : index
    %66 = vector.load %arg9[%c0_143, %c0_144, %c1_145, %c48] : memref<2x8x8x72xf32, #tpu.memory_space<vmem>>, vector<2x7x7x8xf32>
    tpu.vector_store %arg9[%c0_143, %c0_144, %c1_145, %c48], %65 {strides = array<i32>} : memref<2x8x8x72xf32, #tpu.memory_space<vmem>>, vector<2x7x7x8xf32>,
    %c0_146 = arith.constant 0 : index
    %c1_147 = arith.constant 1 : index
    %c0_148 = arith.constant 0 : index
    %c0_149 = arith.constant 0 : index
    %67 = vector.load %arg10[%c0_146, %c1_147, %c0_148, %c0_149] : memref<2x8x8x8xf32, #tpu.memory_space<vmem>>, vector<2x7x8x8xf32>
    %c0_150 = arith.constant 0 : index
    %c0_151 = arith.constant 0 : index
    %c0_152 = arith.constant 0 : index
    %c56 = arith.constant 56 : index
    %68 = vector.load %arg9[%c0_150, %c0_151, %c0_152, %c56] : memref<2x8x8x72xf32, #tpu.memory_space<vmem>>, vector<2x7x8x8xf32>
    tpu.vector_store %arg9[%c0_150, %c0_151, %c0_152, %c56], %67 {strides = array<i32>} : memref<2x8x8x72xf32, #tpu.memory_space<vmem>>, vector<2x7x8x8xf32>,
    %c0_153 = arith.constant 0 : index
    %c1_154 = arith.constant 1 : index
    %c1_155 = arith.constant 1 : index
    %c0_156 = arith.constant 0 : index
    %69 = vector.load %arg10[%c0_153, %c1_154, %c1_155, %c0_156] : memref<2x8x8x8xf32, #tpu.memory_space<vmem>>, vector<2x7x7x8xf32>
    %c0_157 = arith.constant 0 : index
    %c0_158 = arith.constant 0 : index
    %c0_159 = arith.constant 0 : index
    %c64 = arith.constant 64 : index
    %70 = vector.load %arg9[%c0_157, %c0_158, %c0_159, %c64] : memref<2x8x8x72xf32, #tpu.memory_space<vmem>>, vector<2x7x7x8xf32>
    tpu.vector_store %arg9[%c0_157, %c0_158, %c0_159, %c64], %69 {strides = array<i32>} : memref<2x8x8x72xf32, #tpu.memory_space<vmem>>, vector<2x7x7x8xf32>,
    %c0_160 = arith.constant 0 : index
    %c0_161 = arith.constant 0 : index
    %c0_162 = arith.constant 0 : index
    %c0_163 = arith.constant 0 : index
    %71 = vector.load %arg9[%c0_160, %c0_161, %c0_162, %c0_163] : memref<2x8x8x72xf32, #tpu.memory_space<vmem>>, vector<2x8x8x72xf32>
    %72 = vector.shape_cast %71 : vector<2x8x8x72xf32> to vector<128x72xf32>
    %c0_164 = arith.constant 0 : index
    %c0_165 = arith.constant 0 : index
    %73 = vector.load %arg4[%c0_164, %c0_165] : memref<72x8xf32, #tpu.memory_space<vmem>>, vector<72x8xf32>
    %cst_166 = arith.constant dense<0.000000e+00> : vector<128x8xf32>
    %74 = tpu.matmul %72, %73, %cst_166 {dimension_numbers = #tpu.dot_dimension_numbers<[1], [0], [0], [1], [0, 0, 1, 1], [], []>} : vector<128x72xf32>, vector<72x8xf32>, vector<128x8xf32> -> vector<128x8xf32>
    %c0_167 = arith.constant 0 : index
    %c0_168 = arith.constant 0 : index
    %75 = vector.load %arg5[%c0_167, %c0_168] : memref<1x8xf32, #tpu.memory_space<vmem>>, vector<1x8xf32>
    %c0_169 = arith.constant 0 : index
    %c0_170 = arith.constant 0 : index
    %76 = vector.load %arg6[%c0_169, %c0_170] : memref<1x8xf32, #tpu.memory_space<vmem>>, vector<1x8xf32>
    %cst_171 = arith.constant dense<0.000000e+00> : vector<8xf32>
    %77 = vector.multi_reduction <add>, %74, %cst_171 [0] : vector<128x8xf32> to vector<8xf32>
    %78 = vector.shape_cast %77 : vector<8xf32> to vector<1x8xf32>
    %79 = arith.mulf %74, %74 : vector<128x8xf32>
    %cst_172 = arith.constant dense<0.000000e+00> : vector<8xf32>
    %80 = vector.multi_reduction <add>, %79, %cst_172 [0] : vector<128x8xf32> to vector<8xf32>
    %81 = vector.shape_cast %80 : vector<8xf32> to vector<1x8xf32>
    %cst_173 = arith.constant 7.812500e-03 : f32
    %82 = vector.broadcast %cst_173 : f32 to vector<1x8xf32>
    %83 = arith.mulf %78, %82 : vector<1x8xf32>
    %cst_174 = arith.constant 7.812500e-03 : f32
    %84 = vector.broadcast %cst_174 : f32 to vector<1x8xf32>
    %85 = arith.mulf %81, %84 : vector<1x8xf32>
    %86 = arith.mulf %83, %83 : vector<1x8xf32>
    %87 = arith.subf %85, %86 : vector<1x8xf32>
    %cst_175 = arith.constant 9.99999974E-6 : f32
    %88 = vector.broadcast %cst_175 : f32 to vector<1x8xf32>
    %89 = arith.addf %87, %88 : vector<1x8xf32>
    %90 = math.rsqrt %89 : vector<1x8xf32>
    %91 = arith.mulf %90, %75 : vector<1x8xf32>
    %92 = vector.broadcast %83 : vector<1x8xf32> to vector<128x8xf32>
    %93 = arith.subf %74, %92 : vector<128x8xf32>
    %94 = vector.broadcast %91 : vector<1x8xf32> to vector<128x8xf32>
    %95 = arith.mulf %93, %94 : vector<128x8xf32>
    %96 = vector.broadcast %76 : vector<1x8xf32> to vector<128x8xf32>
    %97 = arith.addf %95, %96 : vector<128x8xf32>
    %cst_176 = arith.constant 0.000000e+00 : f32
    %98 = vector.broadcast %cst_176 : f32 to vector<128x8xf32>
    %99 = arith.maximumf %97, %98 : vector<128x8xf32>
    %100 = tpu.transpose %99, [1, 0] : vector<128x8xf32> -> vector<8x128xf32>
    %c0_177 = arith.constant 0 : index
    %c0_178 = arith.constant 0 : index
    %101 = vector.load %arg7[%c0_177, %c0_178] : memref<8x128xf32, #tpu.memory_space<vmem>>, vector<8x128xf32>
    tpu.vector_store %arg7[%c0_177, %c0_178], %100 {strides = array<i32>} : memref<8x128xf32, #tpu.memory_space<vmem>>, vector<8x128xf32>,
    return
  }
}

</mosaic_0001>

<bundles_post_ra>
// kernel: down_pallas.1
= control target key start
LH: loop header
LB: loop body
LE: loop exit
PB: predicated region body
PF: predicated region fallthrough
CT: control target
= control target key end

     0   :  { %vm26_vm0 = vcmask 293888   ;;  %v2640_v2 = vmov 0.0   ;;  %s2641_s28 = smov 12   ;;  %s2642_s29 = smov 4   ;;  %vm75_vm1 = vcmask 30720   ;;  %vm876_vm2 = vcmask 1043456   ;;  %s3960_s0 = inlined_call_operand.vmem [shape: f32[2,8,8,4], index: 0, kind: input, shape index: {}]   ;;  %s3961_s1 = inlined_call_operand.vmem [shape: f32[36,8], index: 1, kind: input, shape index: {}]   ;;  %s3962_s2 = inlined_call_operand.vmem [shape: f32[1,8], index: 2, kind: input, shape index: {}]   ;;  %s3963_s3 = inlined_call_operand.vmem [shape: f32[1,8], index: 3, kind: input, shape index: {}]   ;;  %s3964_s4 = inlined_call_operand.vmem [shape: f32[72,8], index: 4, kind: input, shape index: {}]   ;;  %s3965_s5 = inlined_call_operand.vmem [shape: f32[1,8], index: 5, kind: input, shape index: {}]   ;;  %s3966_s6 = inlined_call_operand.vmem [shape: f32[1,8], index: 6, kind: input, shape index: {}]   ;;  %s3967_s7 = inlined_call_operand.vmem [shape: f32[8,128], index: 7, kind: output, shape index: {}]  }
   0x1   :  { %v260_v0 = vld [vmem:[%s3960_s0] sm:$0x7f]  ;;  %27 = vst.msk [vmem:[#allocation2] sm:$0xff] %vm26_vm0, %v2640_v2  ;;  %28 = vst.msk [vmem:[#allocation2 + $0x8] sm:$0xff] %vm26_vm0, %v2640_v2  ;;  %v261_v3 = vld [vmem:[%s3960_s0 + $0x8] sm:$0x7f] }
   0x2   :  { %v90_v1 = vld [vmem:[%s3960_s0] sm:$0xff]  ;;  %29 = vst.msk [vmem:[#allocation2 + $0x10] sm:$0xff] %vm26_vm0, %v2640_v2  ;;  %30 = vst.msk [vmem:[#allocation2 + $0x18] sm:$0xff] %vm26_vm0, %v2640_v2  ;;  %292 = vrot.lane.b32.xlu1 %v260_v0, %s2641_s28  ;;  %s2643_s11 = smov 8   ;;  %v91_v5 = vld [vmem:[%s3960_s0 + $0x8] sm:$0xff]  ;;  %s2644_s14 = smov 16  }
   0x3   :  { %31 = vst.msk [vmem:[#allocation2 + $0x20] sm:$0xff] %vm26_vm0, %v2640_v2  ;;  %32 = vst.msk [vmem:[#allocation2 + $0x28] sm:$0xff] %vm26_vm0, %v2640_v2  ;;  %118 = vrot.lane.b32.xlu0 %v90_v1, %s2642_s29  ;;  %v175_v4 = vld [vmem:[%s3960_s0 + $0x1] sm:$0x7f]  ;;  %s2645_s17 = smov 20   ;;  %v92_v8 = vld [vmem:[%s3960_s0 + $0x10] sm:$0xff] }
   0x4   :  { %33 = vst.msk [vmem:[#allocation2 + $0x30] sm:$0xff] %vm26_vm0, %v2640_v2  ;;  %34 = vst.msk [vmem:[#allocation2 + $0x38] sm:$0xff] %vm26_vm0, %v2640_v2  ;;  %v454_v6 = vld [vmem:[%s3960_s0 + $0x1] sm:$0x7f]  ;;  %v176_v7 = vld [vmem:[%s3960_s0 + $0x9] sm:$0x7f] }
   0x5   :  { %35 = vst.msk [vmem:[#allocation2 + $0x40] sm:$0xff] %vm26_vm0, %v2640_v2  ;;  %36 = vst.msk [vmem:[#allocation2 + $0x48] sm:$0xff] %vm26_vm0, %v2640_v2  ;;  %v60_v9 = vld [vmem:[%s3960_s0] sm:$0x7f]  ;;  %v2390_v10 = vld [vmem:[%s3960_s0 + $0x8] sm:$0x7f] }
   0x6   :  { %37 = vst.msk [vmem:[#allocation2 + $0x50] sm:$0xff] %vm26_vm0, %v2640_v2  ;;  %38 = vst.msk [vmem:[#allocation2 + $0x58] sm:$0xff] %vm26_vm0, %v2640_v2  ;;  %294 = vrot.lane.b32.xlu1 %v261_v3, %s2641_s28  ;;  %v455_v11 = vld [vmem:[%s3960_s0 + $0x9] sm:$0x7f]  ;;  %v62_v13 = vld [vmem:[%s3960_s0 + $0x10] sm:$0x7f] }
   0x7   :  { %39 = vst.msk [vmem:[#allocation2 + $0x60] sm:$0xff] %vm26_vm0, %v2640_v2  ;;  %40 = vst.msk [vmem:[#allocation2 + $0x68] sm:$0xff] %vm26_vm0, %v2640_v2  ;;  %203 = vrot.lane.b32.xlu0 %v175_v4, %s2643_s11  ;;  %v61_v12 = vld [vmem:[%s3960_s0 + $0x8] sm:$0x7f]  ;;  %s2646_s12 = smov 24   ;;  %v823_v18 = vld [vmem:[%s3961_s1] sm:$0xff] }
   0x8   :  { %41 = vst.msk [vmem:[#allocation2 + $0x70] sm:$0xff] %vm26_vm0, %v2640_v2  ;;  %42 = vst.msk [vmem:[#allocation2 + $0x78] sm:$0xff] %vm26_vm0, %v2640_v2  ;;  %v262_v14 = vld [vmem:[%s3960_s0 + $0x10] sm:$0x7f]  ;;  %v63_v17 = vld [vmem:[%s3960_s0 + $0x18] sm:$0x7f] }
   0x9   :  { %76 = vst.msk [vmem:[#allocation2 + $0x9] sm:$0x7f] %vm75_vm1, %v60_v9  ;;  %77 = vst.msk [vmem:[#allocation2 + $0x11] sm:$0x7f] %vm75_vm1, %v61_v12  ;;  %v177_v15 = vld [vmem:[%s3960_s0 + $0x11] sm:$0x7f] }
   0xa   :  { %120 = vrot.lane.b32.xlu1 %v91_v5, %s2642_s29  ;;  %78 = vst.msk [vmem:[#allocation2 + $0x19] sm:$0x7f] %vm75_vm1, %v62_v13  ;;  %v2391_v16 = vld [vmem:[%s3960_s0 + $0x10] sm:$0x7f]  ;;  %79 = vst.msk [vmem:[#allocation2 + $0x21] sm:$0x7f] %vm75_vm1, %v63_v17 }
   0xb   :  { %389 = vrot.lane.b32.xlu0 %v90_v1, %s2644_s14  ;;  %v824_v19 = vld [vmem:[%s3961_s1 + $0x8] sm:$0xff]  ;;  %s2647_s27 = smov 28   ;;  %v263_v21 = vld [vmem:[%s3960_s0 + $0x18] sm:$0x7f]  ;;  %v825_v22 = vld [vmem:[%s3961_s1 + $0x10] sm:$0xff]  ;;  %s2648_s21 = smov 32  }
   0xc   :  { %v2589_v20 = vpack.c.bf16 %v824_v19, %v823_v18  ;;  %v826_v23 = vld [vmem:[%s3961_s1 + $0x18] sm:$0xff]  ;;  %v2418_v25 = vld [vmem:[%s3960_s0 + $0x9] sm:$0x7f]  ;;  %v64_v26 = vld [vmem:[%s3960_s0 + $0x20] sm:$0x7f]  ;;  %vm340_vm3 = vcmask 129120  }
   0xd   :  { %v2593_v24 = vpack.c.bf16 %v826_v23, %v825_v22  ;;  %80 = vst.msk [vmem:[#allocation2 + $0x29] sm:$0x7f] %vm75_vm1, %v64_v26  ;;  %v827_v27 = vld [vmem:[%s3961_s1 + $0x20] sm:$0xf]  ;;  %v360_v28 = vld [vmem:[%s3960_s0 + $0x18] sm:$0xff]  ;;  %v362_v41 = vld [vmem:[%s3960_s0 + $0x28] sm:$0xff] }
   0xe   :  { %486 = vrot.lane.b32.xlu1 %v454_v6, %s2645_s17  ;;  %2590 = vmatprep.subr.bf16.mxu0 %v2589_v20  ;;  %v2419_v29 = vld [vmem:[%s3960_s0 + $0x11] sm:$0x7f]  ;;  %v178_v31 = vld [vmem:[%s3960_s0 + $0x19] sm:$0x7f]  ;;  %v94_v32 = vld [vmem:[%s3960_s0 + $0x20] sm:$0xff]  ;;  %vm160_vm4 = vcmask 64544  }
   0xf   :  { %391 = vrot.lane.b32.xlu0 %v91_v5, %s2644_s14  ;;  %2592 = vmatpush3.bf16.msra.mxu0 %v2589_v20  ;;  %v456_v30 = vld [vmem:[%s3960_s0 + $0x11] sm:$0x7f]  ;;  %v2392_v33 = vld [vmem:[%s3960_s0 + $0x18] sm:$0x7f]  ;;  %v264_v35 = vld [vmem:[%s3960_s0 + $0x20] sm:$0x7f] }
  0x10   :  { %2594 = vmatprep.subr.bf16.mxu0 %v2593_v24  ;;  %v457_v34 = vld [vmem:[%s3960_s0 + $0x19] sm:$0x7f]  ;;  %v179_v36 = vld [vmem:[%s3960_s0 + $0x21] sm:$0x7f]  ;;  %v65_v38 = vld [vmem:[%s3960_s0 + $0x28] sm:$0x7f] }
  0x11   :  { %v2393_v37 = vld [vmem:[%s3960_s0 + $0x20] sm:$0x7f]  ;;  %81 = vst.msk [vmem:[#allocation2 + $0x31] sm:$0x7f] %vm75_vm1, %v65_v38  ;;  %v265_v39 = vld [vmem:[%s3960_s0 + $0x28] sm:$0x7f] }
  0x12   :  { %205 = vrot.lane.b32.xlu1 %v176_v7, %s2643_s11  ;;  %v2420_v40 = vld [vmem:[%s3960_s0 + $0x19] sm:$0x7f]  ;;  %v2421_v42 = vld [vmem:[%s3960_s0 + $0x21] sm:$0x7f]  ;;  %v459_v44 = vld [vmem:[%s3960_s0 + $0x29] sm:$0x7f] }
  0x13   :  { %122 = vrot.lane.b32.xlu0 %v92_v8, %s2642_s29  ;;  %2596 = vmatpush3.bf16.msra.mxu0 %v2593_v24  ;;  %v458_v43 = vld [vmem:[%s3960_s0 + $0x21] sm:$0x7f]  ;;  %v180_v45 = vld [vmem:[%s3960_s0 + $0x29] sm:$0x7f]  ;;  %v266_v46 = vld [vmem:[%s3960_s0 + $0x30] sm:$0x7f] }
  0x14   :  { %2521 = vmatprep.subr.msk.mxu0 %vm876_vm2, %v827_v27  ;;  %v2394_v47 = vld [vmem:[%s3960_s0 + $0x28] sm:$0x7f]  ;;  %v66_v48 = vld [vmem:[%s3960_s0 + $0x30] sm:$0x7f]  ;;  %v67_v51 = vld [vmem:[%s3960_s0 + $0x40] sm:$0x7f] }
  0x15   :  { %82 = vst.msk [vmem:[#allocation2 + $0x39] sm:$0x7f] %vm75_vm1, %v66_v48  ;;  %v2395_v49 = vld [vmem:[%s3960_s0 + $0x30] sm:$0x7f]  ;;  %83 = vst.msk [vmem:[#allocation2 + $0x49] sm:$0x7f] %vm75_vm1, %v67_v51 }
  0x16   :  { %580 = vrot.lane.b32.xlu1 %v2390_v10, %s2646_s12  ;;  %v2409_v50 = vld [vmem:[%s3960_s0 + $0x30] sm:$0xff]  ;;  %v2422_v52 = vld [vmem:[%s3960_s0 + $0x29] sm:$0x7f]  ;;  %v97_v56 = vld [vmem:[%s3960_s0 + $0x40] sm:$0xff]  ;;  %vm245_vm5 = vcmask 96320   ;;  %vm437_vm6 = vcmask 162944  }
  0x17   :  { %488 = vrot.lane.b32.xlu0 %v455_v11, %s2645_s17  ;;  %2522 = vmatpush3.msk.msra.mxu0 %vm876_vm2, %v827_v27  ;;  %v2423_v53 = vld [vmem:[%s3960_s0 + $0x31] sm:$0x7f]  ;;  %v182_v57 = vld [vmem:[%s3960_s0 + $0x41] sm:$0x7f]  ;;  %v2396_v58 = vld [vmem:[%s3960_s0 + $0x38] sm:$0x7f] }
  0x18   :  { %v460_v54 = vld [vmem:[%s3960_s0 + $0x31] sm:$0x7f]  ;;  %v268_v59 = vld [vmem:[%s3960_s0 + $0x40] sm:$0x7f]  ;;  %v267_v60 = vld [vmem:[%s3960_s0 + $0x38] sm:$0x7f] }
  0x19   :  { %v181_v55 = vld [vmem:[%s3960_s0 + $0x31] sm:$0x7f]  ;;  %v68_v61 = vld [vmem:[%s3960_s0 + $0x48] sm:$0x7f]  ;;  %v2410_v63 = vld [vmem:[%s3960_s0 + $0x38] sm:$0xff]  ;;  %vm534_vm7 = vcmask 194720  }
  0x1a   :  { %296 = vrot.lane.b32.xlu1 %v262_v14, %s2641_s28  ;;  %84 = vst.msk [vmem:[#allocation2 + $0x51] sm:$0x7f] %vm75_vm1, %v68_v61  ;;  %v269_v62 = vld [vmem:[%s3960_s0 + $0x48] sm:$0x7f]  ;;  %v2424_v7 = vld [vmem:[%s3960_s0 + $0x39] sm:$0x7f] }
  0x1b   :  { %207 = vrot.lane.b32.xlu0 %v177_v15, %s2643_s11  ;;  %v98_v6 = vld [vmem:[%s3960_s0 + $0x48] sm:$0xff]  ;;  %v461_v10 = vld [vmem:[%s3960_s0 + $0x39] sm:$0x7f]  ;;  %v99_v13 = vld [vmem:[%s3960_s0 + $0x50] sm:$0xff]  ;;  %vm622_vm8 = vcmask 227520   ;;  %vm707_vm9 = vcmask 261344  }
  0x1c   :  { %v462_v14 = vld [vmem:[%s3960_s0 + $0x41] sm:$0x7f]  ;;  %v463_v17 = vld [vmem:[%s3960_s0 + $0x49] sm:$0x7f]  ;;  %v270_v26 = vld [vmem:[%s3960_s0 + $0x50] sm:$0x7f] }
  0x1d   :  { %v183_v18 = vld [vmem:[%s3960_s0 + $0x49] sm:$0x7f]  ;;  %vm792_vm10 = vcmask 293120   ;;  %v465_v48 = vld [vmem:[%s3960_s0 + $0x59] sm:$0x7f]  ;;  %vm1027_vm11 = vcmask 64512  }
  0x1e   :  { %665 = vrot.lane.b32.xlu1 %v91_v5, %s2647_s27  ;;  %v69_v5 = vld [vmem:[%s3960_s0 + $0x50] sm:$0x7f]  ;;  %v2397_v22 = vld [vmem:[%s3960_s0 + $0x48] sm:$0x7f]  ;;  %vm43_vm12 = vcmask 588800   ;;  %vm1230_vm13 = vcmask 63488  }
  0x1f   :  { %582 = vrot.lane.b32.xlu0 %v2391_v16, %s2646_s12  ;;  %85 = vst.msk [vmem:[#allocation2 + $0x59] sm:$0x7f] %vm75_vm1, %v69_v5  ;;  %v72_v61 = vld [vmem:[%s3960_s0 + $0x68] sm:$0x7f]  ;;  %v2427_v5 = vld [vmem:[%s3960_s0 + $0x59] sm:$0x7f] }
  0x20   :  { %88 = vst.msk [vmem:[#allocation2 + $0x71] sm:$0x7f] %vm75_vm1, %v72_v61  ;;  %s2651_s18 = smov 56   ;;  %vm1315_vm14 = vcmask 130112   ;;  %vm1495_vm15 = vcmask 260288   ;;  %vm1689_vm2 = vcmask 391488  }
  0x21   :  { %46 = vst.msk [vmem:[#allocation3 + $0x10] sm:$0xff] %vm43_vm12, %v2640_v2  ;;  %44 = vst.msk [vmem:[#allocation3] sm:$0xff] %vm43_vm12, %v2640_v2 }
  0x22   :  { %393 = vrot.lane.b32.xlu1 %v92_v8, %s2644_s14  ;;  %45 = vst.msk [vmem:[#allocation3 + $0x8] sm:$0xff] %vm43_vm12, %v2640_v2  ;;  %47 = vst.msk [vmem:[#allocation3 + $0x18] sm:$0xff] %vm43_vm12, %v2640_v2 }
  0x23   :  { %298 = vrot.lane.b32.xlu0 %v263_v21, %s2641_s28  ;;  %v184_v21 = vld [vmem:[%s3960_s0 + $0x51] sm:$0x7f]  ;;  %48 = vst.msk [vmem:[#allocation3 + $0x20] sm:$0xff] %vm43_vm12, %v2640_v2  ;;  %49 = vst.msk [vmem:[#allocation3 + $0x28] sm:$0xff] %vm43_vm12, %v2640_v2 }
  0x24   :  { %50 = vst.msk [vmem:[#allocation3 + $0x30] sm:$0xff] %vm43_vm12, %v2640_v2  ;;  %51 = vst.msk [vmem:[#allocation3 + $0x38] sm:$0xff] %vm43_vm12, %v2640_v2 }
  0x25   :  { %52 = vst.msk [vmem:[#allocation3 + $0x40] sm:$0xff] %vm43_vm12, %v2640_v2  ;;  %53 = vst.msk [vmem:[#allocation3 + $0x48] sm:$0xff] %vm43_vm12, %v2640_v2 }
  0x26   :  { %750 = vrot.lane.b32.xlu1 %v2418_v25, %s2648_s21  ;;  %v2398_v25 = vld [vmem:[%s3960_s0 + $0x50] sm:$0x7f]  ;;  %54 = vst.msk [vmem:[#allocation3 + $0x50] sm:$0xff] %vm43_vm12, %v2640_v2  ;;  %55 = vst.msk [vmem:[#allocation3 + $0x58] sm:$0xff] %vm43_vm12, %v2640_v2 }
  0x27   :  { %667 = vrot.lane.b32.xlu0 %v92_v8, %s2647_s27  ;;  %56 = vst.msk [vmem:[#allocation3 + $0x60] sm:$0xff] %vm43_vm12, %v2640_v2  ;;  %57 = vst.msk [vmem:[#allocation3 + $0x68] sm:$0xff] %vm43_vm12, %v2640_v2 }
  0x28   :  { %58 = vst.msk [vmem:[#allocation3 + $0x70] sm:$0xff] %vm43_vm12, %v2640_v2  ;;  %59 = vst.msk [vmem:[#allocation3 + $0x78] sm:$0xff] %vm43_vm12, %v2640_v2 }
  0x2a   :  { %395 = vrot.lane.b32.xlu1 %v360_v28, %s2644_s14 }
  0x2b   :  { %124 = vrot.lane.b32.xlu0 %v360_v28, %s2642_s29 }
  0x2e   :  { %752 = vrot.lane.b32.xlu1 %v2419_v29, %s2648_s21  ;;  %v70_v29 = vld [vmem:[%s3960_s0 + $0x58] sm:$0x7f] }
  0x2f   :  { %490 = vrot.lane.b32.xlu0 %v456_v30, %s2645_s17  ;;  %86 = vst.msk [vmem:[#allocation2 + $0x61] sm:$0x7f] %vm75_vm1, %v70_v29  ;;  %v271_v30 = vld [vmem:[%s3960_s0 + $0x58] sm:$0x7f]  ;;  %v2429_v29 = vld [vmem:[%s3960_s0 + $0x69] sm:$0x7f] }
  0x32   :  { %209 = vrot.lane.b32.xlu1 %v178_v31, %s2643_s11 }
  0x33   :  { %126 = vrot.lane.b32.xlu0 %v94_v32, %s2642_s29 }
  0x36   :  { %584 = vrot.lane.b32.xlu1 %v2392_v33, %s2646_s12 }
  0x37   :  { %492 = vrot.lane.b32.xlu0 %v457_v34, %s2645_s17 }
  0x3a   :  { %300 = vrot.lane.b32.xlu1 %v264_v35, %s2641_s28  ;;  %v71_v35 = vld [vmem:[%s3960_s0 + $0x60] sm:$0x7f] }
  0x3b   :  { %211 = vrot.lane.b32.xlu0 %v179_v36, %s2643_s11  ;;  %87 = vst.msk [vmem:[#allocation2 + $0x69] sm:$0x7f] %vm75_vm1, %v71_v35  ;;  %v100_v36 = vld [vmem:[%s3960_s0 + $0x58] sm:$0xff]  ;;  %v188_v35 = vld [vmem:[%s3960_s0 + $0x71] sm:$0x7f] }
  0x3e   :  { %669 = vrot.lane.b32.xlu1 %v360_v28, %s2647_s27 }
  0x3f   :  { %586 = vrot.lane.b32.xlu0 %v2393_v37, %s2646_s12  ;;  %v2425_v37 = vld [vmem:[%s3960_s0 + $0x49] sm:$0x7f] }
  0x42   :  { %397 = vrot.lane.b32.xlu1 %v94_v32, %s2644_s14 }
  0x43   :  { %302 = vrot.lane.b32.xlu0 %v265_v39, %s2641_s28 }
  0x46   :  { %754 = vrot.lane.b32.xlu1 %v2420_v40, %s2648_s21  ;;  %v464_v40 = vld [vmem:[%s3960_s0 + $0x51] sm:$0x7f] }
  0x47   :  { %671 = vrot.lane.b32.xlu0 %v94_v32, %s2647_s27 }
  0x4a   :  { %399 = vrot.lane.b32.xlu1 %v362_v41, %s2644_s14 }
  0x4b   :  { %128 = vrot.lane.b32.xlu0 %v362_v41, %s2642_s29 }
  0x4e   :  { %756 = vrot.lane.b32.xlu1 %v2421_v42, %s2648_s21 }
  0x4f   :  { %494 = vrot.lane.b32.xlu0 %v458_v43, %s2645_s17 }
  0x52   :  { %496 = vrot.lane.b32.xlu1 %v459_v44, %s2645_s17  ;;  %v101_v44 = vld [vmem:[%s3960_s0 + $0x60] sm:$0xff] }
  0x53   :  { %213 = vrot.lane.b32.xlu0 %v180_v45, %s2643_s11  ;;  %v2426_v45 = vld [vmem:[%s3960_s0 + $0x51] sm:$0x7f] }
  0x56   :  { %304 = vrot.lane.b32.xlu1 %v266_v46, %s2641_s28 }
  0x57   :  { %588 = vrot.lane.b32.xlu0 %v2394_v47, %s2646_s12 }
  0x5a   :  { %673 = vrot.lane.b32.xlu1 %v362_v41, %s2647_s27 }
  0x5b   :  { %590 = vrot.lane.b32.xlu0 %v2395_v49, %s2646_s12  ;;  %v185_v49 = vld [vmem:[%s3960_s0 + $0x59] sm:$0x7f] }
  0x5e   :  { %675 = vrot.lane.b32.xlu1 %v2409_v50, %s2647_s27 }
  0x5f   :  { %401 = vrot.lane.b32.xlu0 %v2409_v50, %s2644_s14 }
  0x62   :  { %130 = vrot.lane.b32.xlu1 %v2409_v50, %s2642_s29 }
  0x63   :  { %758 = vrot.lane.b32.xlu0 %v2422_v52, %s2648_s21 }
  0x66   :  { %760 = vrot.lane.b32.xlu1 %v2423_v53, %s2648_s21  ;;  %v186_v53 = vld [vmem:[%s3960_s0 + $0x61] sm:$0x7f] }
  0x67   :  { %498 = vrot.lane.b32.xlu0 %v460_v54, %s2645_s17  ;;  %v2399_v54 = vld [vmem:[%s3960_s0 + $0x58] sm:$0x7f] }
  0x6a   :  { %215 = vrot.lane.b32.xlu1 %v181_v55, %s2643_s11 }
  0x6b   :  { %132 = vrot.lane.b32.xlu0 %v97_v56, %s2642_s29 }
  0x6e   :  { %217 = vrot.lane.b32.xlu1 %v182_v57, %s2643_s11  ;;  %v2400_v57 = vld [vmem:[%s3960_s0 + $0x60] sm:$0x7f] }
  0x6f   :  { %592 = vrot.lane.b32.xlu0 %v2396_v58, %s2646_s12  ;;  %v272_v58 = vld [vmem:[%s3960_s0 + $0x60] sm:$0x7f] }
  0x72   :  { %308 = vrot.lane.b32.xlu1 %v268_v59, %s2641_s28 }
  0x73   :  { %306 = vrot.lane.b32.xlu0 %v267_v60, %s2641_s28 }
  0x74   :  { %v293_v0 = vpop.permute.xlu1 %292 }
  0x75   :  { %v119_v1 = vpop.permute.xlu0 %118  ;;  %341 = vst.msk [vmem:[#allocation2 + $0x1] sm:$0x7f] %vm340_vm3, %v293_v0 }
  0x76   :  { %161 = vst.msk [vmem:[#allocation2 + $0x8] sm:$0xff] %vm160_vm4, %v119_v1  ;;  %310 = vrot.lane.b32.xlu1 %v269_v62, %s2641_s28  ;;  %v273_v62 = vld [vmem:[%s3960_s0 + $0x68] sm:$0x7f] }
  0x77   :  { %677 = vrot.lane.b32.xlu0 %v2410_v63, %s2647_s27 }
  0x78   :  { %v295_v3 = vpop.permute.xlu1 %294 }
  0x79   :  { %v204_v4 = vpop.permute.xlu0 %203 }
  0x7a   :  { %246 = vst.msk [vmem:[#allocation2 + $0x8] sm:$0x7f] %vm245_vm5, %v204_v4  ;;  %405 = vrot.lane.b32.xlu1 %v97_v56, %s2644_s14  ;;  %v102_v4 = vld [vmem:[%s3960_s0 + $0x68] sm:$0xff] }
  0x7b   :  { %342 = vst.msk [vmem:[#allocation2 + $0x9] sm:$0x7f] %vm340_vm3, %v295_v3  ;;  %403 = vrot.lane.b32.xlu0 %v2410_v63, %s2644_s14 }
  0x7c   :  { %v121_v8 = vpop.permute.xlu1 %120 }
  0x7d   :  { %v390_v9 = vpop.permute.xlu0 %389  ;;  %162 = vst.msk [vmem:[#allocation2 + $0x10] sm:$0xff] %vm160_vm4, %v121_v8  ;;  %v466_v8 = vld [vmem:[%s3960_s0 + $0x61] sm:$0x7f] }
  0x7e   :  { %438 = vst.msk [vmem:[#allocation2] sm:$0xff] %vm437_vm6, %v390_v9  ;;  %134 = vrot.lane.b32.xlu1 %v98_v6, %s2642_s29 }
  0x7f   :  { %762 = vrot.lane.b32.xlu0 %v2424_v7, %s2648_s21 }
  0x80   :  { %v487_v11 = vpop.permute.xlu1 %486 }
  0x81   :  { %v392_v12 = vpop.permute.xlu0 %391  ;;  %535 = vst.msk [vmem:[#allocation2] sm:$0x7f] %vm534_vm7, %v487_v11 }
  0x82   :  { %439 = vst.msk [vmem:[#allocation2 + $0x8] sm:$0xff] %vm437_vm6, %v392_v12  ;;  %500 = vrot.lane.b32.xlu1 %v461_v10, %s2645_s17  ;;  %v187_v12 = vld [vmem:[%s3960_s0 + $0x69] sm:$0x7f] }
  0x83   :  { %407 = vrot.lane.b32.xlu0 %v98_v6, %s2644_s14 }
  0x84   :  { %v206_v15 = vpop.permute.xlu1 %205 }
  0x85   :  { %v123_v16 = vpop.permute.xlu0 %122  ;;  %247 = vst.msk [vmem:[#allocation2 + $0x10] sm:$0x7f] %vm245_vm5, %v206_v15 }
  0x86   :  { %163 = vst.msk [vmem:[#allocation2 + $0x18] sm:$0xff] %vm160_vm4, %v123_v16  ;;  %136 = vrot.lane.b32.xlu1 %v99_v13, %s2642_s29  ;;  %v2401_v16 = vld [vmem:[%s3960_s0 + $0x68] sm:$0x7f] }
  0x87   :  { %502 = vrot.lane.b32.xlu0 %v462_v14, %s2645_s17 }
  0x88   :  { %v581_v19 = vpop.permute.xlu1 %580 }
  0x89   :  { %v489_v20 = vpop.permute.xlu0 %488  ;;  %623 = vst.msk [vmem:[#allocation2 + $0x1] sm:$0x7f] %vm622_vm8, %v581_v19 }
  0x8a   :  { %536 = vst.msk [vmem:[#allocation2 + $0x8] sm:$0x7f] %vm534_vm7, %v489_v20  ;;  %504 = vrot.lane.b32.xlu1 %v463_v17, %s2645_s17  ;;  %v467_v17 = vld [vmem:[%s3960_s0 + $0x69] sm:$0x7f] }
  0x8b   :  { %219 = vrot.lane.b32.xlu0 %v183_v18, %s2643_s11 }
  0x8c   :  { %v297_v23 = vpop.permute.xlu1 %296 }
  0x8d   :  { %v208_v24 = vpop.permute.xlu0 %207  ;;  %343 = vst.msk [vmem:[#allocation2 + $0x11] sm:$0x7f] %vm340_vm3, %v297_v23  ;;  %v73_v23 = vld [vmem:[%s3960_s0 + $0x70] sm:$0x7f] }
  0x8e   :  { %248 = vst.msk [vmem:[#allocation2 + $0x18] sm:$0x7f] %vm245_vm5, %v208_v24  ;;  %221 = vrot.lane.b32.xlu1 %v184_v21, %s2643_s11  ;;  %v2402_v21 = vld [vmem:[%s3960_s0 + $0x70] sm:$0x7f] }
  0x8f   :  { %594 = vrot.lane.b32.xlu0 %v2397_v22, %s2646_s12  ;;  %v274_v22 = vld [vmem:[%s3960_s0 + $0x70] sm:$0x7f]  ;;  %89 = vst.msk [vmem:[#allocation2 + $0x79] sm:$0x7f] %vm75_vm1, %v73_v23  ;;  %vm1592_vm1 = vcmask 326912  }
  0x90   :  { %v666_v27 = vpop.permute.xlu1 %665 }
  0x91   :  { %v583_v28 = vpop.permute.xlu0 %582  ;;  %708 = vst.msk [vmem:[#allocation2] sm:$0xff] %vm707_vm9, %v666_v27 }
  0x92   :  { %624 = vst.msk [vmem:[#allocation2 + $0x9] sm:$0x7f] %vm622_vm8, %v583_v28  ;;  %596 = vrot.lane.b32.xlu1 %v2398_v25, %s2646_s12 }
  0x93   :  { %312 = vrot.lane.b32.xlu0 %v270_v26, %s2641_s28  ;;  %v371_v26 = vld [vmem:[%s3960_s0 + $0x70] sm:$0xff] }
  0x94   :  { %v394_v31 = vpop.permute.xlu1 %393 }
  0x95   :  { %v299_v32 = vpop.permute.xlu0 %298  ;;  %440 = vst.msk [vmem:[#allocation2 + $0x10] sm:$0xff] %vm437_vm6, %v394_v31 }
  0x96   :  { %344 = vst.msk [vmem:[#allocation2 + $0x19] sm:$0x7f] %vm340_vm3, %v299_v32  ;;  %314 = vrot.lane.b32.xlu1 %v271_v30, %s2641_s28  ;;  %v468_v32 = vld [vmem:[%s3960_s0 + $0x71] sm:$0x7f] }
  0x97   :  { %679 = vrot.lane.b32.xlu0 %v98_v6, %s2647_s27 }
  0x98   :  { %v751_v33 = vpop.permute.xlu1 %750 }
  0x99   :  { %v668_v34 = vpop.permute.xlu0 %667  ;;  %793 = vst.msk [vmem:[#allocation2] sm:$0x7f] %vm792_vm10, %v751_v33 }
  0x9a   :  { %709 = vst.msk [vmem:[#allocation2 + $0x8] sm:$0xff] %vm707_vm9, %v668_v34  ;;  %681 = vrot.lane.b32.xlu1 %v99_v13, %s2647_s27 }
  0x9b   :  { %409 = vrot.lane.b32.xlu0 %v99_v13, %s2644_s14  ;;  %v2428_v13 = vld [vmem:[%s3960_s0 + $0x61] sm:$0x7f] }
  0x9c   :  { %v396_v38 = vpop.permute.xlu1 %395 }
  0x9d   :  { %v125_v39 = vpop.permute.xlu0 %124  ;;  %441 = vst.msk [vmem:[#allocation2 + $0x18] sm:$0xff] %vm437_vm6, %v396_v38 }
  0x9e   :  { %164 = vst.msk [vmem:[#allocation2 + $0x20] sm:$0xff] %vm160_vm4, %v125_v39  ;;  %138 = vrot.lane.b32.xlu1 %v100_v36, %s2642_s29 }
  0x9f   :  { %764 = vrot.lane.b32.xlu0 %v2425_v37, %s2648_s21 }
  0xa0   :  { %v753_v41 = vpop.permute.xlu1 %752  ;;  %v807_v43 = vld [vmem:[#allocation2] sm:$0xff] }
  0xa1   :  { %v491_v42 = vpop.permute.xlu0 %490  ;;  %794 = vst.msk [vmem:[#allocation2 + $0x8] sm:$0x7f] %vm792_vm10, %v753_v41  ;;  %2523 = vmatprep.mubr.msk.f32.mxu0 %vm26_vm0, %v807_v43  ;;  %v2403_v41 = vld [vmem:[%s3960_s0 + $0x78] sm:$0x7f] }
  0xa2   :  { %537 = vst.msk [vmem:[#allocation2 + $0x10] sm:$0x7f] %vm534_vm7, %v491_v42  ;;  %506 = vrot.lane.b32.xlu1 %v464_v40, %s2645_s17  ;;  %v275_v40 = vld [vmem:[%s3960_s0 + $0x78] sm:$0x7f] }
  0xa3   :  { %411 = vrot.lane.b32.xlu0 %v100_v36, %s2644_s14 }
  0xa4   :  { %v210_v46 = vpop.permute.xlu1 %209 }
  0xa5   :  { %v127_v47 = vpop.permute.xlu0 %126  ;;  %249 = vst.msk [vmem:[#allocation2 + $0x20] sm:$0x7f] %vm245_vm5, %v210_v46 }
  0xa6   :  { %165 = vst.msk [vmem:[#allocation2 + $0x28] sm:$0xff] %vm160_vm4, %v127_v47  ;;  %140 = vrot.lane.b32.xlu1 %v101_v44, %s2642_s29 }
  0xa7   :  { %766 = vrot.lane.b32.xlu0 %v2426_v45, %s2648_s21  ;;  %v372_v45 = vld [vmem:[%s3960_s0 + $0x78] sm:$0xff] }
  0xa8   :  { %v585_v50 = vpop.permute.xlu1 %584  ;;  %v808_v52 = vld [vmem:[#allocation2 + $0x8] sm:$0xff] }
  0xa9   :  { %v493_v51 = vpop.permute.xlu0 %492  ;;  %625 = vst.msk [vmem:[#allocation2 + $0x11] sm:$0x7f] %vm622_vm8, %v585_v50  ;;  %2524 = vmatmul.mubr.msk.f32.vlgmr.msra.gmra.mrb[0].mxu0 %vm26_vm0, %v808_v52 }
  0xaa   :  { %538 = vst.msk [vmem:[#allocation2 + $0x18] sm:$0x7f] %vm534_vm7, %v493_v51  ;;  %508 = vrot.lane.b32.xlu1 %v465_v48, %s2645_s17  ;;  %v469_v48 = vld [vmem:[%s3960_s0 + $0x79] sm:$0x7f] }
  0xab   :  { %223 = vrot.lane.b32.xlu0 %v185_v49, %s2643_s11  ;;  %v2431_v49 = vld [vmem:[%s3960_s0 + $0x79] sm:$0x7f] }
  0xac   :  { %v301_v55 = vpop.permute.xlu1 %300 }
  0xad   :  { %v212_v56 = vpop.permute.xlu0 %211  ;;  %345 = vst.msk [vmem:[#allocation2 + $0x21] sm:$0x7f] %vm340_vm3, %v301_v55 }
  0xae   :  { %250 = vst.msk [vmem:[#allocation2 + $0x28] sm:$0x7f] %vm245_vm5, %v212_v56  ;;  %225 = vrot.lane.b32.xlu1 %v186_v53, %s2643_s11 }
  0xaf   :  { %598 = vrot.lane.b32.xlu0 %v2399_v54, %s2646_s12 }
  0xb0   :  { %v670_v59 = vpop.permute.xlu1 %669 }
  0xb1   :  { %v587_v60 = vpop.permute.xlu0 %586  ;;  %710 = vst.msk [vmem:[#allocation2 + $0x10] sm:$0xff] %vm707_vm9, %v670_v59 }
  0xb2   :  { %626 = vst.msk [vmem:[#allocation2 + $0x19] sm:$0x7f] %vm622_vm8, %v587_v60  ;;  %600 = vrot.lane.b32.xlu1 %v2400_v57, %s2646_s12 }
  0xb3   :  { %316 = vrot.lane.b32.xlu0 %v272_v58, %s2641_s28 }
  0xb4   :  { %v398_v63 = vpop.permute.xlu1 %397 }
  0xb5   :  { %v303_v0 = vpop.permute.xlu0 %302  ;;  %442 = vst.msk [vmem:[#allocation2 + $0x20] sm:$0xff] %vm437_vm6, %v398_v63 }
  0xb6   :  { %346 = vst.msk [vmem:[#allocation2 + $0x29] sm:$0x7f] %vm340_vm3, %v303_v0  ;;  %318 = vrot.lane.b32.xlu1 %v273_v62, %s2641_s28 }
  0xb7   :  { %683 = vrot.lane.b32.xlu0 %v100_v36, %s2647_s27  ;;  %v2430_v36 = vld [vmem:[%s3960_s0 + $0x71] sm:$0x7f]  ;;  %s2652_s0 = smov 64  }
  0xb8   :  { %v755_v1 = vpop.permute.xlu1 %754 }
  0xb9   :  { %v672_v3 = vpop.permute.xlu0 %671  ;;  %795 = vst.msk [vmem:[#allocation2 + $0x10] sm:$0x7f] %vm792_vm10, %v755_v1 }
  0xba   :  { %711 = vst.msk [vmem:[#allocation2 + $0x18] sm:$0xff] %vm707_vm9, %v672_v3  ;;  %685 = vrot.lane.b32.xlu1 %v101_v44, %s2647_s27 }
  0xbb   :  { %413 = vrot.lane.b32.xlu0 %v101_v44, %s2644_s14 }
  0xbc   :  { %v400_v6 = vpop.permute.xlu1 %399 }
  0xbd   :  { %v129_v7 = vpop.permute.xlu0 %128  ;;  %443 = vst.msk [vmem:[#allocation2 + $0x28] sm:$0xff] %vm437_vm6, %v400_v6 }
  0xbe   :  { %166 = vst.msk [vmem:[#allocation2 + $0x30] sm:$0xff] %vm160_vm4, %v129_v7  ;;  %142 = vrot.lane.b32.xlu1 %v102_v4, %s2642_s29 }
  0xbf   :  { %768 = vrot.lane.b32.xlu0 %v2427_v5, %s2648_s21 }
  0xc0   :  { %v757_v9 = vpop.permute.xlu1 %756  ;;  %v809_v11 = vld [vmem:[#allocation2 + $0x10] sm:$0xff] }
  0xc1   :  { %v495_v10 = vpop.permute.xlu0 %494  ;;  %796 = vst.msk [vmem:[#allocation2 + $0x18] sm:$0x7f] %vm792_vm10, %v757_v9  ;;  %2526 = vmatprep.mubr.msk.f32.mxu0 %vm26_vm0, %v809_v11 }
  0xc2   :  { %539 = vst.msk [vmem:[#allocation2 + $0x20] sm:$0x7f] %vm534_vm7, %v495_v10  ;;  %510 = vrot.lane.b32.xlu1 %v466_v8, %s2645_s17 }
  0xc3   :  { %415 = vrot.lane.b32.xlu0 %v102_v4, %s2644_s14 }
  0xc4   :  { %v497_v14 = vpop.permute.xlu1 %496 }
  0xc5   :  { %v214_v15 = vpop.permute.xlu0 %213  ;;  %540 = vst.msk [vmem:[#allocation2 + $0x28] sm:$0x7f] %vm534_vm7, %v497_v14 }
  0xc6   :  { %251 = vst.msk [vmem:[#allocation2 + $0x30] sm:$0x7f] %vm245_vm5, %v214_v15  ;;  %227 = vrot.lane.b32.xlu1 %v187_v12, %s2643_s11 }
  0xc7   :  { %770 = vrot.lane.b32.xlu0 %v2428_v13, %s2648_s21 }
  0xc8   :  { %v305_v18 = vpop.permute.xlu1 %304  ;;  %v810_v20 = vld [vmem:[#allocation2 + $0x18] sm:$0xff] }
  0xc9   :  { %v589_v19 = vpop.permute.xlu0 %588  ;;  %347 = vst.msk [vmem:[#allocation2 + $0x31] sm:$0x7f] %vm340_vm3, %v305_v18  ;;  %2527 = vmatmul.mubr.msk.f32.gmra.mrb[2].mxu0 %vm26_vm0, %v810_v20 }
  0xca   :  { %627 = vst.msk [vmem:[#allocation2 + $0x21] sm:$0x7f] %vm622_vm8, %v589_v19  ;;  %602 = vrot.lane.b32.xlu1 %v2401_v16, %s2646_s12 }
  0xcb   :  { %512 = vrot.lane.b32.xlu0 %v467_v17, %s2645_s17 }
  0xcc   :  { %v674_v24 = vpop.permute.xlu1 %673 }
  0xcd   :  { %v591_v25 = vpop.permute.xlu0 %590  ;;  %712 = vst.msk [vmem:[#allocation2 + $0x20] sm:$0xff] %vm707_vm9, %v674_v24 }
  0xce   :  { %628 = vst.msk [vmem:[#allocation2 + $0x29] sm:$0x7f] %vm622_vm8, %v591_v25  ;;  %604 = vrot.lane.b32.xlu1 %v2402_v21, %s2646_s12 }
  0xcf   :  { %320 = vrot.lane.b32.xlu0 %v274_v22, %s2641_s28 }
  0xd0   :  { %v676_v27 = vpop.permute.xlu1 %675 }
  0xd1   :  { %v402_v28 = vpop.permute.xlu0 %401  ;;  %713 = vst.msk [vmem:[#allocation2 + $0x28] sm:$0xff] %vm707_vm9, %v676_v27 }
  0xd2   :  { %444 = vst.msk [vmem:[#allocation2 + $0x30] sm:$0xff] %vm437_vm6, %v402_v28  ;;  %417 = vrot.lane.b32.xlu1 %v371_v26, %s2644_s14 }
  0xd3   :  { %687 = vrot.lane.b32.xlu0 %v102_v4, %s2647_s27 }
  0xd4   :  { %v131_v30 = vpop.permute.xlu1 %130 }
  0xd5   :  { %v759_v31 = vpop.permute.xlu0 %758  ;;  %167 = vst.msk [vmem:[#allocation2 + $0x38] sm:$0xff] %vm160_vm4, %v131_v30 }
  0xd6   :  { %797 = vst.msk [vmem:[#allocation2 + $0x20] sm:$0x7f] %vm792_vm10, %v759_v31  ;;  %772 = vrot.lane.b32.xlu1 %v2429_v29, %s2648_s21 }
  0xd7   :  { %689 = vrot.lane.b32.xlu0 %v371_v26, %s2647_s27 }
  0xd8   :  { %v761_v33 = vpop.permute.xlu1 %760 }
  0xd9   :  { %v499_v34 = vpop.permute.xlu0 %498  ;;  %798 = vst.msk [vmem:[#allocation2 + $0x28] sm:$0x7f] %vm792_vm10, %v761_v33 }
  0xda   :  { %541 = vst.msk [vmem:[#allocation2 + $0x30] sm:$0x7f] %vm534_vm7, %v499_v34  ;;  %514 = vrot.lane.b32.xlu1 %v468_v32, %s2645_s17 }
  0xdb   :  { %144 = vrot.lane.b32.xlu0 %v371_v26, %s2642_s29 }
  0xdc   :  { %v216_v37 = vpop.permute.xlu1 %215 }
  0xdd   :  { %v133_v38 = vpop.permute.xlu0 %132  ;;  %v811_v39 = vld [vmem:[#allocation2 + $0x20] sm:$0xff]  ;;  %252 = vst.msk [vmem:[#allocation2 + $0x38] sm:$0x7f] %vm245_vm5, %v216_v37 }
  0xde   :  { %168 = vst.msk [vmem:[#allocation2 + $0x48] sm:$0xff] %vm160_vm4, %v133_v38  ;;  %2529 = vmatprep.mubr.msk.f32.mxu0 %vm26_vm0, %v811_v39  ;;  %229 = vrot.lane.b32.xlu1 %v188_v35, %s2643_s11 }
  0xdf   :  { %774 = vrot.lane.b32.xlu0 %v2430_v36, %s2648_s21 }
  0xe0   :  { %v218_v42 = vpop.permute.xlu1 %217  ;;  %v812_v44 = vld [vmem:[#allocation2 + $0x28] sm:$0xff] }
  0xe1   :  { %v593_v43 = vpop.permute.xlu0 %592  ;;  %253 = vst.msk [vmem:[#allocation2 + $0x48] sm:$0x7f] %vm245_vm5, %v218_v42  ;;  %2530 = vmatmul.mubr.msk.f32.gmra.mrb[4].mxu0 %vm26_vm0, %v812_v44 }
  0xe2   :  { %629 = vst.msk [vmem:[#allocation2 + $0x31] sm:$0x7f] %vm622_vm8, %v593_v43  ;;  %322 = vrot.lane.b32.xlu1 %v275_v40, %s2641_s28 }
  0xe3   :  { %606 = vrot.lane.b32.xlu0 %v2403_v41, %s2646_s12 }
  0xe4   :  { %v309_v46 = vpop.permute.xlu1 %308 }
  0xe5   :  { %v307_v47 = vpop.permute.xlu0 %306  ;;  %349 = vst.msk [vmem:[#allocation2 + $0x41] sm:$0x7f] %vm340_vm3, %v309_v46 }
  0xe6   :  { %348 = vst.msk [vmem:[#allocation2 + $0x39] sm:$0x7f] %vm340_vm3, %v307_v47  ;;  %419 = vrot.lane.b32.xlu1 %v372_v45, %s2644_s14 }
  0xe7   :  { %691 = vrot.lane.b32.xlu0 %v372_v45, %s2647_s27 }
  0xe8   :  { %v311_v50 = vpop.permute.xlu1 %310 }
  0xe9   :  { %v678_v51 = vpop.permute.xlu0 %677  ;;  %350 = vst.msk [vmem:[#allocation2 + $0x49] sm:$0x7f] %vm340_vm3, %v311_v50 }
  0xea   :  { %714 = vst.msk [vmem:[#allocation2 + $0x30] sm:$0xff] %vm707_vm9, %v678_v51  ;;  %516 = vrot.lane.b32.xlu1 %v469_v48, %s2645_s17 }
  0xeb   :  { %776 = vrot.lane.b32.xlu0 %v2431_v49, %s2648_s21 }
  0xec   :  { %v406_v52 = vpop.permute.xlu1 %405 }
  0xed   :  { %v404_v53 = vpop.permute.xlu0 %403  ;;  %446 = vst.msk [vmem:[#allocation2 + $0x40] sm:$0xff] %vm437_vm6, %v406_v52 }
  0xee   :  { %445 = vst.msk [vmem:[#allocation2 + $0x38] sm:$0xff] %vm437_vm6, %v404_v53 }
  0xf0   :  { %v135_v54 = vpop.permute.xlu1 %134 }
  0xf1   :  { %v763_v55 = vpop.permute.xlu0 %762  ;;  %169 = vst.msk [vmem:[#allocation2 + $0x50] sm:$0xff] %vm160_vm4, %v135_v54 }
  0xf2   :  { %799 = vst.msk [vmem:[#allocation2 + $0x30] sm:$0x7f] %vm792_vm10, %v763_v55 }
  0xf4   :  { %v501_v56 = vpop.permute.xlu1 %500 }
  0xf5   :  { %v408_v57 = vpop.permute.xlu0 %407  ;;  %542 = vst.msk [vmem:[#allocation2 + $0x38] sm:$0x7f] %vm534_vm7, %v501_v56 }
  0xf6   :  { %447 = vst.msk [vmem:[#allocation2 + $0x48] sm:$0xff] %vm437_vm6, %v408_v57 }
  0xf8   :  { %v137_v58 = vpop.permute.xlu1 %136 }
  0xf9   :  { %v503_v59 = vpop.permute.xlu0 %502  ;;  %v813_v60 = vld [vmem:[#allocation2 + $0x30] sm:$0xff]  ;;  %170 = vst.msk [vmem:[#allocation2 + $0x58] sm:$0xff] %vm160_vm4, %v137_v58 }
  0xfa   :  { %543 = vst.msk [vmem:[#allocation2 + $0x40] sm:$0x7f] %vm534_vm7, %v503_v59  ;;  %2532 = vmatprep.mubr.msk.f32.mxu0 %vm26_vm0, %v813_v60 }
  0xfc   :  { %v505_v61 = vpop.permute.xlu1 %504  ;;  %v814_v63 = vld [vmem:[#allocation2 + $0x38] sm:$0xff] }
  0xfd   :  { %v220_v62 = vpop.permute.xlu0 %219  ;;  %544 = vst.msk [vmem:[#allocation2 + $0x48] sm:$0x7f] %vm534_vm7, %v505_v61  ;;  %2533 = vmatmul.mubr.msk.f32.gmra.mrb[6].mxu0 %vm26_vm0, %v814_v63 }
  0xfe   :  { %254 = vst.msk [vmem:[#allocation2 + $0x50] sm:$0x7f] %vm245_vm5, %v220_v62 }
 0x100   :  { %v222_v0 = vpop.permute.xlu1 %221 }
 0x101   :  { %v595_v1 = vpop.permute.xlu0 %594  ;;  %255 = vst.msk [vmem:[#allocation2 + $0x58] sm:$0x7f] %vm245_vm5, %v222_v0 }
 0x102   :  { %630 = vst.msk [vmem:[#allocation2 + $0x41] sm:$0x7f] %vm622_vm8, %v595_v1 }
 0x104   :  { %v597_v3 = vpop.permute.xlu1 %596 }
 0x105   :  { %v313_v4 = vpop.permute.xlu0 %312  ;;  %631 = vst.msk [vmem:[#allocation2 + $0x49] sm:$0x7f] %vm622_vm8, %v597_v3 }
 0x106   :  { %351 = vst.msk [vmem:[#allocation2 + $0x51] sm:$0x7f] %vm340_vm3, %v313_v4 }
 0x108   :  { %v315_v5 = vpop.permute.xlu1 %314 }
 0x109   :  { %v680_v6 = vpop.permute.xlu0 %679  ;;  %352 = vst.msk [vmem:[#allocation2 + $0x59] sm:$0x7f] %vm340_vm3, %v315_v5 }
 0x10a   :  { %715 = vst.msk [vmem:[#allocation2 + $0x40] sm:$0xff] %vm707_vm9, %v680_v6 }
 0x10c   :  { %v682_v7 = vpop.permute.xlu1 %681 }
 0x10d   :  { %v410_v8 = vpop.permute.xlu0 %409  ;;  %716 = vst.msk [vmem:[#allocation2 + $0x48] sm:$0xff] %vm707_vm9, %v682_v7 }
 0x10e   :  { %448 = vst.msk [vmem:[#allocation2 + $0x50] sm:$0xff] %vm437_vm6, %v410_v8 }
 0x110   :  { %v139_v9 = vpop.permute.xlu1 %138 }
 0x111   :  { %v765_v10 = vpop.permute.xlu0 %764  ;;  %171 = vst.msk [vmem:[#allocation2 + $0x60] sm:$0xff] %vm160_vm4, %v139_v9 }
 0x112   :  { %800 = vst.msk [vmem:[#allocation2 + $0x40] sm:$0x7f] %vm792_vm10, %v765_v10 }
 0x114   :  { %v507_v11 = vpop.permute.xlu1 %506 }
 0x115   :  { %v412_v12 = vpop.permute.xlu0 %411  ;;  %545 = vst.msk [vmem:[#allocation2 + $0x50] sm:$0x7f] %vm534_vm7, %v507_v11 }
 0x116   :  { %449 = vst.msk [vmem:[#allocation2 + $0x58] sm:$0xff] %vm437_vm6, %v412_v12 }
 0x118   :  { %v141_v13 = vpop.permute.xlu1 %140 }
 0x119   :  { %v767_v14 = vpop.permute.xlu0 %766  ;;  %v815_v15 = vld [vmem:[#allocation2 + $0x40] sm:$0xff]  ;;  %172 = vst.msk [vmem:[#allocation2 + $0x68] sm:$0xff] %vm160_vm4, %v141_v13 }
 0x11a   :  { %801 = vst.msk [vmem:[#allocation2 + $0x48] sm:$0x7f] %vm792_vm10, %v767_v14  ;;  %2535 = vmatprep.mubr.msk.f32.mxu0 %vm26_vm0, %v815_v15 }
 0x11c   :  { %v509_v16 = vpop.permute.xlu1 %508 }
 0x11d   :  { %v224_v17 = vpop.permute.xlu0 %223  ;;  %546 = vst.msk [vmem:[#allocation2 + $0x58] sm:$0x7f] %vm534_vm7, %v509_v16 }
 0x11e   :  { %256 = vst.msk [vmem:[#allocation2 + $0x60] sm:$0x7f] %vm245_vm5, %v224_v17 }
 0x120   :  { %v226_v18 = vpop.permute.xlu1 %225 }
 0x121   :  { %v599_v19 = vpop.permute.xlu0 %598  ;;  %v816_v20 = vld [vmem:[#allocation2 + $0x48] sm:$0xff]  ;;  %257 = vst.msk [vmem:[#allocation2 + $0x68] sm:$0x7f] %vm245_vm5, %v226_v18 }
 0x122   :  { %632 = vst.msk [vmem:[#allocation2 + $0x51] sm:$0x7f] %vm622_vm8, %v599_v19  ;;  %2536 = vmatmul.mubr.msk.f32.gmra.mrb[8].mxu0 %vm26_vm0, %v816_v20 }
 0x124   :  { %v601_v21 = vpop.permute.xlu1 %600 }
 0x125   :  { %v317_v22 = vpop.permute.xlu0 %316  ;;  %633 = vst.msk [vmem:[#allocation2 + $0x59] sm:$0x7f] %vm622_vm8, %v601_v21 }
 0x126   :  { %353 = vst.msk [vmem:[#allocation2 + $0x61] sm:$0x7f] %vm340_vm3, %v317_v22 }
 0x128   :  { %v319_v23 = vpop.permute.xlu1 %318 }
 0x129   :  { %v684_v24 = vpop.permute.xlu0 %683  ;;  %354 = vst.msk [vmem:[#allocation2 + $0x69] sm:$0x7f] %vm340_vm3, %v319_v23 }
 0x12a   :  { %717 = vst.msk [vmem:[#allocation2 + $0x50] sm:$0xff] %vm707_vm9, %v684_v24 }
 0x12c   :  { %v686_v25 = vpop.permute.xlu1 %685 }
 0x12d   :  { %v414_v26 = vpop.permute.xlu0 %413  ;;  %718 = vst.msk [vmem:[#allocation2 + $0x58] sm:$0xff] %vm707_vm9, %v686_v25 }
 0x12e   :  { %450 = vst.msk [vmem:[#allocation2 + $0x60] sm:$0xff] %vm437_vm6, %v414_v26 }
 0x130   :  { %v143_v27 = vpop.permute.xlu1 %142 }
 0x131   :  { %v769_v28 = vpop.permute.xlu0 %768  ;;  %173 = vst.msk [vmem:[#allocation2 + $0x70] sm:$0xff] %vm160_vm4, %v143_v27 }
 0x132   :  { %802 = vst.msk [vmem:[#allocation2 + $0x50] sm:$0x7f] %vm792_vm10, %v769_v28 }
 0x134   :  { %v511_v29 = vpop.permute.xlu1 %510 }
 0x135   :  { %v416_v30 = vpop.permute.xlu0 %415  ;;  %547 = vst.msk [vmem:[#allocation2 + $0x60] sm:$0x7f] %vm534_vm7, %v511_v29 }
 0x136   :  { %451 = vst.msk [vmem:[#allocation2 + $0x68] sm:$0xff] %vm437_vm6, %v416_v30 }
 0x138   :  { %v228_v31 = vpop.permute.xlu1 %227 }
 0x139   :  { %v771_v32 = vpop.permute.xlu0 %770  ;;  %v817_v33 = vld [vmem:[#allocation2 + $0x50] sm:$0xff]  ;;  %258 = vst.msk [vmem:[#allocation2 + $0x70] sm:$0x7f] %vm245_vm5, %v228_v31 }
 0x13a   :  { %803 = vst.msk [vmem:[#allocation2 + $0x58] sm:$0x7f] %vm792_vm10, %v771_v32  ;;  %2538 = vmatprep.mubr.msk.f32.mxu0 %vm26_vm0, %v817_v33 }
 0x13c   :  { %v603_v34 = vpop.permute.xlu1 %602 }
 0x13d   :  { %v513_v35 = vpop.permute.xlu0 %512  ;;  %634 = vst.msk [vmem:[#allocation2 + $0x61] sm:$0x7f] %vm622_vm8, %v603_v34 }
 0x13e   :  { %548 = vst.msk [vmem:[#allocation2 + $0x68] sm:$0x7f] %vm534_vm7, %v513_v35 }
 0x140   :  { %v605_v36 = vpop.permute.xlu1 %604 }
 0x141   :  { %v321_v37 = vpop.permute.xlu0 %320  ;;  %v818_v38 = vld [vmem:[#allocation2 + $0x58] sm:$0xff]  ;;  %635 = vst.msk [vmem:[#allocation2 + $0x69] sm:$0x7f] %vm622_vm8, %v605_v36 }
 0x142   :  { %355 = vst.msk [vmem:[#allocation2 + $0x71] sm:$0x7f] %vm340_vm3, %v321_v37  ;;  %2539 = vmatmul.mubr.msk.f32.gmra.mrb[10].mxu0 %vm26_vm0, %v818_v38 }
 0x144   :  { %v418_v39 = vpop.permute.xlu1 %417 }
 0x145   :  { %v688_v40 = vpop.permute.xlu0 %687  ;;  %452 = vst.msk [vmem:[#allocation2 + $0x70] sm:$0xff] %vm437_vm6, %v418_v39 }
 0x146   :  { %719 = vst.msk [vmem:[#allocation2 + $0x60] sm:$0xff] %vm707_vm9, %v688_v40 }
 0x148   :  { %v773_v41 = vpop.permute.xlu1 %772 }
 0x149   :  { %v690_v42 = vpop.permute.xlu0 %689  ;;  %804 = vst.msk [vmem:[#allocation2 + $0x60] sm:$0x7f] %vm792_vm10, %v773_v41 }
 0x14a   :  { %720 = vst.msk [vmem:[#allocation2 + $0x68] sm:$0xff] %vm707_vm9, %v690_v42 }
 0x14c   :  { %v515_v43 = vpop.permute.xlu1 %514 }
 0x14d   :  { %v145_v44 = vpop.permute.xlu0 %144  ;;  %549 = vst.msk [vmem:[#allocation2 + $0x70] sm:$0x7f] %vm534_vm7, %v515_v43 }
 0x14e   :  { %174 = vst.msk [vmem:[#allocation2 + $0x78] sm:$0xff] %vm160_vm4, %v145_v44  ;;  %vm1862_vm4 = vcmask 523712  }
 0x150   :  { %v230_v45 = vpop.permute.xlu1 %229  ;;  %v819_v47 = vld [vmem:[#allocation2 + $0x60] sm:$0xff] }
 0x151   :  { %v775_v46 = vpop.permute.xlu0 %774  ;;  %259 = vst.msk [vmem:[#allocation2 + $0x78] sm:$0x7f] %vm245_vm5, %v230_v45  ;;  %2541 = vmatprep.mubr.msk.f32.mxu0 %vm26_vm0, %v819_v47  ;;  %vm1947_vm5 = vcmask 588288  }
 0x152   :  { %805 = vst.msk [vmem:[#allocation2 + $0x68] sm:$0x7f] %vm792_vm10, %v775_v46 }
 0x154   :  { %v323_v48 = vpop.permute.xlu1 %322 }
 0x155   :  { %v607_v49 = vpop.permute.xlu0 %606  ;;  %356 = vst.msk [vmem:[#allocation2 + $0x79] sm:$0x7f] %vm340_vm3, %v323_v48  ;;  %vm1777_vm3 = vcmask 457088  }
 0x156   :  { %636 = vst.msk [vmem:[#allocation2 + $0x71] sm:$0x7f] %vm622_vm8, %v607_v49 }
 0x158   :  { %v420_v50 = vpop.permute.xlu1 %419 }
 0x159   :  { %v692_v51 = vpop.permute.xlu0 %691  ;;  %v820_v52 = vld [vmem:[#allocation2 + $0x68] sm:$0xff]  ;;  %453 = vst.msk [vmem:[#allocation2 + $0x78] sm:$0xff] %vm437_vm6, %v420_v50 }
 0x15a   :  { %721 = vst.msk [vmem:[#allocation2 + $0x70] sm:$0xff] %vm707_vm9, %v692_v51  ;;  %2542 = vmatmul.mubr.msk.f32.gmra.mrb[12].mxu0 %vm26_vm0, %v820_v52 }
 0x15c   :  { %v517_v53 = vpop.permute.xlu1 %516 }
 0x15d   :  { %v777_v54 = vpop.permute.xlu0 %776  ;;  %550 = vst.msk [vmem:[#allocation2 + $0x78] sm:$0x7f] %vm534_vm7, %v517_v53 }
 0x15e   :  { %806 = vst.msk [vmem:[#allocation2 + $0x70] sm:$0x7f] %vm792_vm10, %v777_v54 }
 0x164   :  { %v822_v56 = vld [vmem:[#allocation2 + $0x78] sm:$0xff] }
 0x165   :  { %v821_v55 = vld [vmem:[#allocation2 + $0x70] sm:$0xff] }
 0x166   :  { %2544 = vmatprep.mubr.msk.f32.mxu0 %vm26_vm0, %v821_v55 }
 0x167   :  { %2545 = vmatmul.mubr.msk.f32.gmra.mrb[14].mxu0 %vm26_vm0, %v822_v56  ;;  %vm1400_vm0 = vcmask 194688  }
 0x17c   :  { %v3318_v57 = vpop.f32.mrb[0].mxu0 }
 0x17d   :  { %v1029_v58 = vsel %vm1027_vm11, %v3318_v57, 0.0  ;;  %v1066_v59 = vmul.f32 %v3318_v57, %v3318_v57  ;;  %v3324_v60 = vpop.f32.mrb[1].mxu0 }
 0x17e   :  { %v1028_v61 = vsel %vm1027_vm11, %v3324_v60, 0.0  ;;  %v1065_v62 = vmul.f32 %v3324_v60, %v3324_v60 }
 0x17f   :  { %v1082_v63 = vsel %vm1027_vm11, %v1066_v59, 0.0  ;;  %v1030_v0 = vadd.f32 %v1029_v58, %v1028_v61 }
 0x180   :  { %v1081_v1 = vsel %vm1027_vm11, %v1065_v62, 0.0 }
 0x181   :  { %v1083_v3 = vadd.f32 %v1082_v63, %v1081_v1 }
 0x19c   :  { %v3332_v4 = vpop.f32.mrb[2].mxu0 }
 0x19d   :  { %v3334_v5 = vpop.f32.mrb[3].mxu0  ;;  %v1068_v6 = vmul.f32 %v3332_v4, %v3332_v4  ;;  %v1033_v10 = vsel %vm1027_vm11, %v3332_v4, 0.0 }
 0x19e   :  { %v1031_v7 = vsel %vm1027_vm11, %v3334_v5, 0.0  ;;  %v1067_v8 = vmul.f32 %v3334_v5, %v3334_v5 }
 0x19f   :  { %v1032_v9 = vadd.f32 %v1031_v7, %v1030_v0  ;;  %v1086_v14 = vsel %vm1027_vm11, %v1068_v6, 0.0 }
 0x1a0   :  { %v1084_v11 = vsel %vm1027_vm11, %v1067_v8, 0.0 }
 0x1a1   :  { %v1085_v12 = vadd.f32 %v1084_v11, %v1083_v3  ;;  %v1034_v13 = vadd.f32 %v1033_v10, %v1032_v9 }
 0x1a3   :  { %v1087_v15 = vadd.f32 %v1086_v14, %v1085_v12 }
 0x1b4   :  { %v3346_v16 = vpop.f32.mrb[4].mxu0 }
 0x1b5   :  { %v3348_v17 = vpop.f32.mrb[5].mxu0  ;;  %v1070_v18 = vmul.f32 %v3346_v16, %v3346_v16  ;;  %v1037_v22 = vsel %vm1027_vm11, %v3346_v16, 0.0 }
 0x1b6   :  { %v1035_v19 = vsel %vm1027_vm11, %v3348_v17, 0.0  ;;  %v1069_v20 = vmul.f32 %v3348_v17, %v3348_v17 }
 0x1b7   :  { %v1036_v21 = vadd.f32 %v1035_v19, %v1034_v13  ;;  %v1090_v26 = vsel %vm1027_vm11, %v1070_v18, 0.0 }
 0x1b8   :  { %v1088_v23 = vsel %vm1027_vm11, %v1069_v20, 0.0 }
 0x1b9   :  { %v1089_v24 = vadd.f32 %v1088_v23, %v1087_v15  ;;  %v1038_v25 = vadd.f32 %v1037_v22, %v1036_v21 }
 0x1bb   :  { %v1091_v27 = vadd.f32 %v1090_v26, %v1089_v24 }
 0x1d0   :  { %v3360_v28 = vpop.f32.mrb[6].mxu0 }
 0x1d1   :  { %v3362_v29 = vpop.f32.mrb[7].mxu0  ;;  %v1072_v30 = vmul.f32 %v3360_v28, %v3360_v28  ;;  %v1041_v34 = vsel %vm1027_vm11, %v3360_v28, 0.0 }
 0x1d2   :  { %v1039_v31 = vsel %vm1027_vm11, %v3362_v29, 0.0  ;;  %v1071_v32 = vmul.f32 %v3362_v29, %v3362_v29 }
 0x1d3   :  { %v1040_v33 = vadd.f32 %v1039_v31, %v1038_v25  ;;  %v1094_v38 = vsel %vm1027_vm11, %v1072_v30, 0.0 }
 0x1d4   :  { %v1092_v35 = vsel %vm1027_vm11, %v1071_v32, 0.0 }
 0x1d5   :  { %v1093_v36 = vadd.f32 %v1092_v35, %v1091_v27  ;;  %v1042_v37 = vadd.f32 %v1041_v34, %v1040_v33 }
 0x1d7   :  { %v1095_v39 = vadd.f32 %v1094_v38, %v1093_v36 }
 0x1f5   :  { %v3374_v40 = vpop.f32.mrb[8].mxu0 }
 0x1f6   :  { %v3376_v41 = vpop.f32.mrb[9].mxu0  ;;  %v1074_v42 = vmul.f32 %v3374_v40, %v3374_v40  ;;  %v1045_v46 = vsel %vm1027_vm11, %v3374_v40, 0.0 }
 0x1f7   :  { %v1043_v43 = vsel %vm1027_vm11, %v3376_v41, 0.0  ;;  %v1073_v44 = vmul.f32 %v3376_v41, %v3376_v41 }
 0x1f8   :  { %v1044_v45 = vadd.f32 %v1043_v43, %v1042_v37  ;;  %v1098_v50 = vsel %vm1027_vm11, %v1074_v42, 0.0 }
 0x1f9   :  { %v1096_v47 = vsel %vm1027_vm11, %v1073_v44, 0.0 }
 0x1fa   :  { %v1097_v48 = vadd.f32 %v1096_v47, %v1095_v39  ;;  %v1046_v49 = vadd.f32 %v1045_v46, %v1044_v45 }
 0x1fc   :  { %v1099_v51 = vadd.f32 %v1098_v50, %v1097_v48 }
 0x215   :  { %v3420_v52 = vpop.f32.mrb[10].mxu0 }
 0x216   :  { %v3422_v53 = vpop.f32.mrb[11].mxu0  ;;  %v1076_v54 = vmul.f32 %v3420_v52, %v3420_v52  ;;  %v1049_v59 = vsel %vm1027_vm11, %v3420_v52, 0.0 }
 0x217   :  { %v1047_v55 = vsel %vm1027_vm11, %v3422_v53, 0.0  ;;  %v1075_v56 = vmul.f32 %v3422_v53, %v3422_v53 }
 0x218   :  { %v1048_v58 = vadd.f32 %v1047_v55, %v1046_v49  ;;  %v1102_v63 = vsel %vm1027_vm11, %v1076_v54, 0.0 }
 0x219   :  { %v1100_v61 = vsel %vm1027_vm11, %v1075_v56, 0.0 }
 0x21a   :  { %v1101_v2 = vadd.f32 %v1100_v61, %v1099_v51  ;;  %v1050_v62 = vadd.f32 %v1049_v59, %v1048_v58 }
 0x21c   :  { %v1103_v0 = vadd.f32 %v1102_v63, %v1101_v2 }
 0x22d   :  { %v3434_v1 = vpop.f32.mrb[12].mxu0 }
 0x22e   :  { %v3436_v3 = vpop.f32.mrb[13].mxu0  ;;  %v1078_v6 = vmul.f32 %v3434_v1, %v3434_v1  ;;  %v1053_v10 = vsel %vm1027_vm11, %v3434_v1, 0.0 }
 0x22f   :  { %v1051_v7 = vsel %vm1027_vm11, %v3436_v3, 0.0  ;;  %v1077_v8 = vmul.f32 %v3436_v3, %v3436_v3 }
 0x230   :  { %v1052_v9 = vadd.f32 %v1051_v7, %v1050_v62  ;;  %v1106_v14 = vsel %vm1027_vm11, %v1078_v6, 0.0 }
 0x231   :  { %v1104_v11 = vsel %vm1027_vm11, %v1077_v8, 0.0 }
 0x232   :  { %v1105_v12 = vadd.f32 %v1104_v11, %v1103_v0  ;;  %v1054_v13 = vadd.f32 %v1053_v10, %v1052_v9 }
 0x234   :  { %v1107_v15 = vadd.f32 %v1106_v14, %v1105_v12 }
 0x23a   :  { %v3448_v18 = vpop.f32.mrb[14].mxu0 }
 0x23b   :  { %v1016_v19 = vpop.f32.mrb[15].mxu0  ;;  %v1080_v20 = vmul.f32 %v3448_v18, %v3448_v18  ;;  %v1057_v24 = vsel %vm1027_vm11, %v3448_v18, 0.0 }
 0x23c   :  { %v1055_v21 = vsel %vm1027_vm11, %v1016_v19, 0.0  ;;  %v1079_v22 = vmul.f32 %v1016_v19, %v1016_v19 }
 0x23d   :  { %v1056_v23 = vadd.f32 %v1055_v21, %v1054_v13  ;;  %v1110_v30 = vsel %vm1027_vm11, %v1080_v20, 0.0 }
 0x23e   :  { %v1108_v25 = vsel %vm1027_vm11, %v1079_v22, 0.0 }
 0x23f   :  { %v1058_v26 = vadd.f32 %v1057_v24, %v1056_v23  ;;  %v1109_v27 = vadd.f32 %v1108_v25, %v1107_v15 }
 0x241   :  { %v1059_v31 = vrot.slane %v1058_v26, 4  ;;  %v1111_v32 = vadd.f32 %v1110_v30, %v1109_v27 }
 0x243   :  { %v1060_v33 = vadd.f32 %v1059_v31, %v1058_v26  ;;  %v1112_v34 = vrot.slane %v1111_v32, 4 }
 0x245   :  { %v1061_v35 = vrot.slane %v1060_v33, 2  ;;  %v1113_v36 = vadd.f32 %v1112_v34, %v1111_v32 }
 0x247   :  { %v1062_v37 = vadd.f32 %v1061_v35, %v1060_v33  ;;  %v1114_v38 = vrot.slane %v1113_v36, 2 }
 0x249   :  { %v1063_v39 = vrot.slane %v1062_v37, 1  ;;  %v1115_v42 = vadd.f32 %v1114_v38, %v1113_v36 }
 0x24b   :  { %v1064_v43 = vadd.f32 %v1063_v39, %v1062_v37  ;;  %v1116_v44 = vrot.slane %v1115_v42, 1 }
 0x24d   :  { %v1117_v45 = vadd.f32 %v1116_v44, %v1115_v42  ;;  %v3457_v46 = vmul.f32 0.0078125, %v1064_v43 }
 0x24f   :  { %v1119_v47 = vmul.f32 0.0078125, %v1117_v45  ;;  %v1120_v48 = vmul.f32 %v3457_v46, %v3457_v46  ;;  %v1139_v49 = vsub.f32 %v1016_v19, %v3457_v46  ;;  %v1126_v50 = vsub.f32 %v3318_v57, %v3457_v46 }
 0x250   :  { %v1125_v51 = vsub.f32 %v3324_v60, %v3457_v46  ;;  %v1127_v54 = vsub.f32 %v3334_v5, %v3457_v46  ;;  %v1128_v55 = vsub.f32 %v3332_v4, %v3457_v46  ;;  %v1129_v56 = vsub.f32 %v3348_v17, %v3457_v46 }
 0x251   :  { %v1121_v58 = vsub.f32 %v1119_v47, %v1120_v48  ;;  %v1130_v59 = vsub.f32 %v3346_v16, %v3457_v46  ;;  %v1131_v61 = vsub.f32 %v3362_v29, %v3457_v46  ;;  %v1133_v57 = vsub.f32 %v3376_v41, %v3457_v46 }
 0x252   :  { %v1132_v60 = vsub.f32 %v3360_v28, %v3457_v46  ;;  %v1134_v5 = vsub.f32 %v3374_v40, %v3457_v46  ;;  %v1135_v4 = vsub.f32 %v3422_v53, %v3457_v46  ;;  %v1136_v17 = vsub.f32 %v3420_v52, %v3457_v46  ;;  %v1025_v40 = vld [vmem:[%s3962_s2] sm:$0x1]  ;;  %s2649_s2 = smov 40  }
 0x253   :  { %v1122_v2 = vadd.f32 1e-05, %v1121_v58  ;;  %v1137_v16 = vsub.f32 %v3436_v3, %v3457_v46  ;;  %v1138_v29 = vsub.f32 %v3434_v1, %v3457_v46  ;;  %v1140_v41 = vsub.f32 %v3448_v18, %v3457_v46  ;;  %v2449_v1 = vld [vmem:[%s3963_s3] ss:$0 sm:$0xff]  ;;  %s2650_s3 = smov 48  }
 0x254   :  { %v1141_v28 = vlaneseq }
 0x255   :  { %2636 = vrsqrt.f32 %v1122_v2 }
 0x256   :  { %v3492_v62 = vshrl.u32 %v1141_v28, 7 }
 0x258   :  { %v1143_v52 = vsub.s32 0, %v3492_v62 }
 0x25f   :  { %v2637_v53 = vpop.eup %2636 }
 0x260   :  { %v1124_v63 = vmul.f32 %v2637_v53, %v1025_v40 }
 0x262   :  { %v1144_v0 = vrot.slane %v1124_v63, %v1143_v52 }
 0x264   :  { %v1159_v3 = vmul.f32 %v1144_v0, %v1139_v49  ;;  %v1146_v6 = vmul.f32 %v1144_v0, %v1126_v50  ;;  %v1145_v7 = vmul.f32 %v1144_v0, %v1125_v51  ;;  %v1147_v8 = vmul.f32 %v1144_v0, %v1127_v54 }
 0x265   :  { %v1148_v9 = vmul.f32 %v1144_v0, %v1128_v55  ;;  %v1149_v10 = vmul.f32 %v1144_v0, %v1129_v56  ;;  %v1150_v11 = vmul.f32 %v1144_v0, %v1130_v59  ;;  %v1151_v12 = vmul.f32 %v1144_v0, %v1131_v61 }
 0x266   :  { %v1181_v13 = vadd.f32 %v2449_v1, %v1159_v3  ;;  %v1168_v14 = vadd.f32 %v2449_v1, %v1146_v6  ;;  %v1167_v15 = vadd.f32 %v2449_v1, %v1145_v7  ;;  %v1169_v18 = vadd.f32 %v2449_v1, %v1147_v8 }
 0x267   :  { %v1170_v19 = vadd.f32 %v2449_v1, %v1148_v9  ;;  %v1171_v20 = vadd.f32 %v2449_v1, %v1149_v10  ;;  %v1172_v21 = vadd.f32 %v2449_v1, %v1150_v11  ;;  %v1173_v22 = vadd.f32 %v2449_v1, %v1151_v12 }
 0x268   :  { %v1197_v23 = vmax.f32 %v1181_v13, 0.0  ;;  %v1184_v24 = vmax.f32 %v1168_v14, 0.0  ;;  %v1183_v25 = vmax.f32 %v1167_v15, 0.0  ;;  %v1185_v26 = vmax.f32 %v1169_v18, 0.0 }
 0x269   :  { %v1186_v27 = vmax.f32 %v1170_v19, 0.0  ;;  %v1187_v30 = vmax.f32 %v1171_v20, 0.0  ;;  %v1188_v31 = vmax.f32 %v1172_v21, 0.0  ;;  %v1189_v32 = vmax.f32 %v1173_v22, 0.0 }
 0x26a   :  { %1213 = vst.msk [vmem:[#allocation4 + $0x70] sm:$0xff] %vm1027_vm11, %v1197_v23  ;;  %1200 = vst.msk [vmem:[#allocation4 + $0x8] sm:$0xff] %vm1027_vm11, %v1184_v24  ;;  %v1153_v33 = vmul.f32 %v1144_v0, %v1133_v57  ;;  %v1152_v34 = vmul.f32 %v1144_v0, %v1132_v60  ;;  %v1154_v35 = vmul.f32 %v1144_v0, %v1134_v5  ;;  %v1978_v23 = vld [vmem:[%s3964_s4] sm:$0xff]  ;;  %v1979_v24 = vld [vmem:[%s3964_s4 + $0x8] sm:$0xff] }
 0x26b   :  { %1199 = vst.msk [vmem:[#allocation4] sm:$0xff] %vm1027_vm11, %v1183_v25  ;;  %1201 = vst.msk [vmem:[#allocation4 + $0x10] sm:$0xff] %vm1027_vm11, %v1185_v26  ;;  %v1155_v36 = vmul.f32 %v1144_v0, %v1135_v4  ;;  %v1156_v37 = vmul.f32 %v1144_v0, %v1136_v17  ;;  %v1157_v38 = vmul.f32 %v1144_v0, %v1137_v16 }
 0x26c   :  { %1202 = vst.msk [vmem:[#allocation4 + $0x18] sm:$0xff] %vm1027_vm11, %v1186_v27  ;;  %1203 = vst.msk [vmem:[#allocation4 + $0x20] sm:$0xff] %vm1027_vm11, %v1187_v30  ;;  %v1175_v39 = vadd.f32 %v2449_v1, %v1153_v33  ;;  %v1174_v42 = vadd.f32 %v2449_v1, %v1152_v34  ;;  %v1176_v43 = vadd.f32 %v2449_v1, %v1154_v35  ;;  %v1980_v27 = vld [vmem:[%s3964_s4 + $0x10] sm:$0xff]  ;;  %v1981_v30 = vld [vmem:[%s3964_s4 + $0x18] sm:$0xff] }
 0x26d   :  { %1204 = vst.msk [vmem:[#allocation4 + $0x28] sm:$0xff] %vm1027_vm11, %v1188_v31  ;;  %1205 = vst.msk [vmem:[#allocation4 + $0x30] sm:$0xff] %vm1027_vm11, %v1189_v32  ;;  %v1158_v44 = vmul.f32 %v1144_v0, %v1138_v29  ;;  %v1177_v45 = vadd.f32 %v2449_v1, %v1155_v36  ;;  %v1178_v46 = vadd.f32 %v2449_v1, %v1156_v37  ;;  %v1982_v34 = vld [vmem:[%s3964_s4 + $0x20] sm:$0xff]  ;;  %v1983_v35 = vld [vmem:[%s3964_s4 + $0x28] sm:$0xff] }
 0x26e   :  { %v1179_v47 = vadd.f32 %v2449_v1, %v1157_v38  ;;  %v1160_v48 = vmul.f32 %v1144_v0, %v1140_v41  ;;  %v1191_v49 = vmax.f32 %v1175_v39, 0.0  ;;  %v1190_v50 = vmax.f32 %v1174_v42, 0.0  ;;  %v1984_v38 = vld [vmem:[%s3964_s4 + $0x30] sm:$0xff]  ;;  %v1985_v39 = vld [vmem:[%s3964_s4 + $0x38] sm:$0xff] }
 0x26f   :  { %v1192_v51 = vmax.f32 %v1176_v43, 0.0  ;;  %v1193_v54 = vmax.f32 %v1177_v45, 0.0  ;;  %v1194_v55 = vmax.f32 %v1178_v46, 0.0  ;;  %v1180_v58 = vadd.f32 %v2449_v1, %v1158_v44  ;;  %v1986_v45 = vld [vmem:[%s3964_s4 + $0x40] sm:$0xff] }
 0x270   :  { %v1195_v56 = vmax.f32 %v1179_v47, 0.0  ;;  %1207 = vst.msk [vmem:[#allocation4 + $0x40] sm:$0xff] %vm1027_vm11, %v1191_v49  ;;  %1206 = vst.msk [vmem:[#allocation4 + $0x38] sm:$0xff] %vm1027_vm11, %v1190_v50  ;;  %v1182_v59 = vadd.f32 %v2449_v1, %v1160_v48  ;;  %v2597_v25 = vpack.c.bf16 %v1979_v24, %v1978_v23  ;;  %v2601_v31 = vpack.c.bf16 %v1981_v30, %v1980_v27 }
 0x271   :  { %1208 = vst.msk [vmem:[#allocation4 + $0x48] sm:$0xff] %vm1027_vm11, %v1192_v51  ;;  %v3514_v61 = vld [vmem:[#allocation4 + $0x8] sm:$0xff]  ;;  %1209 = vst.msk [vmem:[#allocation4 + $0x50] sm:$0xff] %vm1027_vm11, %v1193_v54  ;;  %v1196_v60 = vmax.f32 %v1180_v58, 0.0  ;;  %v1228_v20 = vld [vmem:[#allocation4 + $0x70] sm:$0x7f]  ;;  %v2605_v36 = vpack.c.bf16 %v1983_v35, %v1982_v34  ;;  %v2609_v42 = vpack.c.bf16 %v1985_v39, %v1984_v38 }
 0x272   :  { %v1245_v57 = vld [vmem:[#allocation4] sm:$0xff]  ;;  %1210 = vst.msk [vmem:[#allocation4 + $0x58] sm:$0xff] %vm1027_vm11, %v1194_v55  ;;  %1211 = vst.msk [vmem:[#allocation4 + $0x60] sm:$0xff] %vm1027_vm11, %v1195_v56  ;;  %1275 = vrot.lane.b32.xlu1 %v3514_v61, %s2643_s11  ;;  %v1198_v5 = vmax.f32 %v1182_v59, 0.0  ;;  %v1331_v2 = vld [vmem:[#allocation4 + $0x9] sm:$0x7f]  ;;  %2598 = vmatprep.subr.bf16.mxu0 %v2597_v25 }
 0x273   :  { %1273 = vrot.lane.b32.xlu0 %v1245_v57, %s2643_s11  ;;  %1212 = vst.msk [vmem:[#allocation4 + $0x68] sm:$0xff] %vm1027_vm11, %v1196_v60  ;;  %v1415_v4 = vld [vmem:[#allocation4] sm:$0x7f]  ;;  %v3526_v16 = vld [vmem:[#allocation4 + $0x10] sm:$0xff]  ;;  %v1416_v29 = vld [vmem:[#allocation4 + $0x8] sm:$0x7f]  ;;  %2613 = vmatprep.subr.bf16.mxu1 %v2597_v25 }
 0x274   :  { %1214 = vst.msk [vmem:[#allocation4 + $0x78] sm:$0xff] %vm1027_vm11, %v1198_v5  ;;  %v1330_v17 = vld [vmem:[#allocation4 + $0x1] sm:$0x7f]  ;;  %v1216_v41 = vld [vmem:[#allocation4 + $0x8] sm:$0x7f]  ;;  %v3551_v12 = vld [vmem:[#allocation4 + $0x18] sm:$0xff]  ;;  %2600 = vmatpush3.bf16.msra.mxu0 %v2597_v25  ;;  %2618 = vmatpush3.bf16.msra.mxu1 %v2597_v25 }
 0x275   :  { %v1215_v28 = vld [vmem:[#allocation4] sm:$0x7f]  ;;  %v1417_v40 = vld [vmem:[#allocation4 + $0x10] sm:$0x7f]  ;;  %1232 = vst.msk [vmem:[#allocation3 + $0x11] sm:$0x7f] %vm1230_vm13, %v1216_v41  ;;  %2602 = vmatprep.subr.bf16.mxu0 %v2601_v31  ;;  %2614 = vmatprep.subr.bf16.mxu1 %v2601_v31 }
 0x276   :  { %1447 = vrot.lane.b32.xlu1 %v1415_v4, %s2646_s12  ;;  %v1332_v53 = vld [vmem:[#allocation4 + $0x11] sm:$0x7f]  ;;  %1231 = vst.msk [vmem:[#allocation3 + $0x9] sm:$0x7f] %vm1230_vm13, %v1215_v28  ;;  %v1609_v0 = vld [vmem:[#allocation4 + $0x1] sm:$0x7f] }
 0x277   :  { %1358 = vrot.lane.b32.xlu0 %v1330_v17, %s2644_s14  ;;  %v1217_v63 = vld [vmem:[#allocation4 + $0x10] sm:$0x7f]  ;;  %v1218_v1 = vld [vmem:[#allocation4 + $0x18] sm:$0x7f]  ;;  %v1219_v3 = vld [vmem:[#allocation4 + $0x20] sm:$0x7f] }
 0x278   :  { %1233 = vst.msk [vmem:[#allocation3 + $0x19] sm:$0x7f] %vm1230_vm13, %v1217_v63  ;;  %1234 = vst.msk [vmem:[#allocation3 + $0x21] sm:$0x7f] %vm1230_vm13, %v1218_v1  ;;  %v1418_v6 = vld [vmem:[#allocation4 + $0x18] sm:$0x7f]  ;;  %2604 = vmatpush3.bf16.msra.mxu0 %v2601_v31  ;;  %2619 = vmatpush3.bf16.msra.mxu1 %v2601_v31 }
 0x279   :  { %1235 = vst.msk [vmem:[#allocation3 + $0x29] sm:$0x7f] %vm1230_vm13, %v1219_v3  ;;  %v1220_v7 = vld [vmem:[#allocation4 + $0x28] sm:$0x7f]  ;;  %v1221_v10 = vld [vmem:[#allocation4 + $0x30] sm:$0x7f]  ;;  %2606 = vmatprep.subr.bf16.mxu0 %v2605_v36  ;;  %2615 = vmatprep.subr.bf16.mxu1 %v2605_v36 }
 0x27a   :  { %1360 = vrot.lane.b32.xlu1 %v1331_v2, %s2644_s14  ;;  %1236 = vst.msk [vmem:[#allocation3 + $0x31] sm:$0x7f] %vm1230_vm13, %v1220_v7  ;;  %v1707_v8 = vld [vmem:[#allocation4 + $0x8] sm:$0x7f]  ;;  %1237 = vst.msk [vmem:[#allocation3 + $0x39] sm:$0x7f] %vm1230_vm13, %v1221_v10 }
 0x27b   :  { %1277 = vrot.lane.b32.xlu0 %v3526_v16, %s2643_s11  ;;  %v1610_v9 = vld [vmem:[#allocation4 + $0x9] sm:$0x7f]  ;;  %v1222_v11 = vld [vmem:[#allocation4 + $0x40] sm:$0x7f]  ;;  %v1224_v14 = vld [vmem:[#allocation4 + $0x50] sm:$0x7f] }
 0x27c   :  { %1238 = vst.msk [vmem:[#allocation3 + $0x49] sm:$0x7f] %vm1230_vm13, %v1222_v11  ;;  %v1223_v13 = vld [vmem:[#allocation4 + $0x48] sm:$0x7f]  ;;  %v1225_v15 = vld [vmem:[#allocation4 + $0x58] sm:$0x7f]  ;;  %2608 = vmatpush3.bf16.msra.mxu0 %v2605_v36  ;;  %2620 = vmatpush3.bf16.msra.mxu1 %v2605_v36 }
 0x27d   :  { %1239 = vst.msk [vmem:[#allocation3 + $0x51] sm:$0x7f] %vm1230_vm13, %v1223_v13  ;;  %v1226_v18 = vld [vmem:[#allocation4 + $0x60] sm:$0x7f]  ;;  %1240 = vst.msk [vmem:[#allocation3 + $0x59] sm:$0x7f] %vm1230_vm13, %v1224_v14  ;;  %2610 = vmatprep.subr.bf16.mxu0 %v2609_v42  ;;  %2616 = vmatprep.subr.bf16.mxu1 %v2609_v42 }
 0x27e   :  { %1544 = vrot.lane.b32.xlu1 %v1245_v57, %s2648_s21  ;;  %1241 = vst.msk [vmem:[#allocation3 + $0x61] sm:$0x7f] %vm1230_vm13, %v1225_v15  ;;  %1242 = vst.msk [vmem:[#allocation3 + $0x69] sm:$0x7f] %vm1230_vm13, %v1226_v18  ;;  %v1227_v19 = vld [vmem:[#allocation4 + $0x68] sm:$0x7f] }
 0x27f   :  { %1449 = vrot.lane.b32.xlu0 %v1416_v29, %s2646_s12  ;;  %1243 = vst.msk [vmem:[#allocation3 + $0x71] sm:$0x7f] %vm1230_vm13, %v1227_v19  ;;  %1244 = vst.msk [vmem:[#allocation3 + $0x79] sm:$0x7f] %vm1230_vm13, %v1228_v20  ;;  %v1708_v21 = vld [vmem:[#allocation4 + $0x10] sm:$0x7f] }
 0x280   :  { %v1611_v22 = vld [vmem:[#allocation4 + $0x11] sm:$0x7f]  ;;  %v1249_v26 = vld [vmem:[#allocation4 + $0x20] sm:$0xff]  ;;  %v1612_v32 = vld [vmem:[#allocation4 + $0x19] sm:$0x7f]  ;;  %2612 = vmatpush3.bf16.msra.mxu0 %v2609_v42  ;;  %2621 = vmatpush3.bf16.msra.mxu1 %v2609_v42 }
 0x281   :  { %v1333_v33 = vld [vmem:[#allocation4 + $0x19] sm:$0x7f]  ;;  %v1334_v43 = vld [vmem:[#allocation4 + $0x21] sm:$0x7f]  ;;  %v1877_v44 = vld [vmem:[#allocation4 + $0x9] sm:$0x7f]  ;;  %2563 = vmatprep.subr.mxu0 %v1986_v45  ;;  %2617 = vmatprep.subr.mxu1 %v1986_v45 }
 0x282   :  { %1451 = vrot.lane.b32.xlu1 %v1417_v40, %s2646_s12  ;;  %v1709_v37 = vld [vmem:[#allocation4 + $0x18] sm:$0x7f]  ;;  %v1710_v46 = vld [vmem:[#allocation4 + $0x20] sm:$0x7f]  ;;  %v1878_v48 = vld [vmem:[#allocation4 + $0x11] sm:$0x7f] }
 0x283   :  { %1362 = vrot.lane.b32.xlu0 %v1332_v53, %s2644_s14  ;;  %v1419_v47 = vld [vmem:[#allocation4 + $0x20] sm:$0x7f]  ;;  %v1420_v49 = vld [vmem:[#allocation4 + $0x28] sm:$0x7f]  ;;  %v1879_v50 = vld [vmem:[#allocation4 + $0x19] sm:$0x7f] }
 0x284   :  { %2564 = vmatpush3.msra.mxu0 %v1986_v45  ;;  %2622 = vmatpush3.msra.mxu1 %v1986_v45  ;;  %v1517_v51 = vld [vmem:[#allocation4 + $0x28] sm:$0xff]  ;;  %v1880_v54 = vld [vmem:[#allocation4 + $0x21] sm:$0x7f]  ;;  %v1421_v59 = vld [vmem:[#allocation4 + $0x30] sm:$0x7f] }
 0x285   :  { %v1613_v55 = vld [vmem:[#allocation4 + $0x21] sm:$0x7f]  ;;  %v1614_v56 = vld [vmem:[#allocation4 + $0x29] sm:$0x7f]  ;;  %v1712_v57 = vld [vmem:[#allocation4 + $0x30] sm:$0x7f] }
 0x286   :  { %1641 = vrot.lane.b32.xlu1 %v1609_v0, %s2649_s2  ;;  %v1335_v58 = vld [vmem:[#allocation4 + $0x29] sm:$0x7f]  ;;  %v1797_v60 = vld [vmem:[#allocation4 + $0x30] sm:$0xff]  ;;  %v1337_v29 = vld [vmem:[#allocation4 + $0x41] sm:$0x7f] }
 0x287   :  { %1546 = vrot.lane.b32.xlu0 %v3514_v61, %s2648_s21  ;;  %v1881_v5 = vld [vmem:[#allocation4 + $0x29] sm:$0x7f]  ;;  %v1882_v4 = vld [vmem:[#allocation4 + $0x31] sm:$0x7f]  ;;  %v1713_v41 = vld [vmem:[#allocation4 + $0x38] sm:$0x7f] }
 0x288   :  { %v1615_v17 = vld [vmem:[#allocation4 + $0x31] sm:$0x7f]  ;;  %v1423_v28 = vld [vmem:[#allocation4 + $0x40] sm:$0x7f]  ;;  %v1422_v40 = vld [vmem:[#allocation4 + $0x38] sm:$0x7f] }
 0x289   :  { %v1336_v2 = vld [vmem:[#allocation4 + $0x31] sm:$0x7f]  ;;  %v1424_v0 = vld [vmem:[#allocation4 + $0x48] sm:$0x7f]  ;;  %v1798_v1 = vld [vmem:[#allocation4 + $0x38] sm:$0xff] }
 0x28a   :  { %1548 = vrot.lane.b32.xlu1 %v3526_v16, %s2648_s21  ;;  %v1883_v10 = vld [vmem:[#allocation4 + $0x39] sm:$0x7f]  ;;  %v1254_v18 = vld [vmem:[#allocation4 + $0x50] sm:$0xff]  ;;  %v1617_v19 = vld [vmem:[#allocation4 + $0x41] sm:$0x7f] }
 0x28b   :  { %1453 = vrot.lane.b32.xlu0 %v1418_v6, %s2646_s12  ;;  %v1616_v13 = vld [vmem:[#allocation4 + $0x39] sm:$0x7f]  ;;  %v1338_v23 = vld [vmem:[#allocation4 + $0x49] sm:$0x7f] }
 0x28c   :  { %v1714_v27 = vld [vmem:[#allocation4 + $0x48] sm:$0x7f]  ;;  %v1426_v36 = vld [vmem:[#allocation4 + $0x58] sm:$0x7f] }
 0x28e   :  { %1735 = vrot.lane.b32.xlu1 %v1707_v8, %s2650_s3 }
 0x28f   :  { %1643 = vrot.lane.b32.xlu0 %v1610_v9, %s2649_s2  ;;  %v1253_v9 = vld [vmem:[#allocation4 + $0x48] sm:$0xff] }
 0x292   :  { %1550 = vrot.lane.b32.xlu1 %v3551_v12, %s2648_s21 }
 0x293   :  { %1279 = vrot.lane.b32.xlu0 %v3551_v12, %s2643_s11 }
 0x296   :  { %1737 = vrot.lane.b32.xlu1 %v1708_v21, %s2650_s3 }
 0x297   :  { %1645 = vrot.lane.b32.xlu0 %v1611_v22, %s2649_s2  ;;  %v1618_v22 = vld [vmem:[#allocation4 + $0x49] sm:$0x7f] }
 0x29a   :  { %1281 = vrot.lane.b32.xlu1 %v1249_v26, %s2643_s11 }
 0x29b   :  { %1820 = vrot.lane.b32.xlu0 %v3514_v61, %s2651_s18  ;;  %v1711_v61 = vld [vmem:[#allocation4 + $0x28] sm:$0x7f] }
 0x29e   :  { %1647 = vrot.lane.b32.xlu1 %v1612_v32, %s2649_s2  ;;  %v1715_v32 = vld [vmem:[#allocation4 + $0x50] sm:$0x7f] }
 0x29f   :  { %1364 = vrot.lane.b32.xlu0 %v1333_v33, %s2644_s14  ;;  %v1425_v33 = vld [vmem:[#allocation4 + $0x50] sm:$0x7f] }
 0x2a2   :  { %1822 = vrot.lane.b32.xlu1 %v3526_v16, %s2651_s18  ;;  %v1252_v16 = vld [vmem:[#allocation4 + $0x40] sm:$0xff] }
 0x2a3   :  { %1739 = vrot.lane.b32.xlu0 %v1709_v37, %s2650_s3 }
 0x2a6   :  { %1366 = vrot.lane.b32.xlu1 %v1334_v43, %s2644_s14  ;;  %v1255_v43 = vld [vmem:[#allocation4 + $0x58] sm:$0xff] }
 0x2a7   :  { %1905 = vrot.lane.b32.xlu0 %v1877_v44, %s2652_s0  ;;  %v1884_v44 = vld [vmem:[#allocation4 + $0x49] sm:$0x7f] }
 0x2aa   :  { %1741 = vrot.lane.b32.xlu1 %v1710_v46, %s2650_s3 }
 0x2ab   :  { %1455 = vrot.lane.b32.xlu0 %v1419_v47, %s2646_s12  ;;  %v1619_v47 = vld [vmem:[#allocation4 + $0x51] sm:$0x7f] }
 0x2ae   :  { %1907 = vrot.lane.b32.xlu1 %v1878_v48, %s2652_s0 }
 0x2af   :  { %1824 = vrot.lane.b32.xlu0 %v3551_v12, %s2651_s18 }
 0x2b2   :  { %1552 = vrot.lane.b32.xlu1 %v1249_v26, %s2648_s21 }
 0x2b3   :  { %1457 = vrot.lane.b32.xlu0 %v1420_v49, %s2646_s12 }
 0x2b6   :  { %1909 = vrot.lane.b32.xlu1 %v1879_v50, %s2652_s0  ;;  %v1256_v50 = vld [vmem:[#allocation4 + $0x60] sm:$0xff] }
 0x2b7   :  { %1826 = vrot.lane.b32.xlu0 %v1249_v26, %s2651_s18  ;;  %v1339_v26 = vld [vmem:[#allocation4 + $0x51] sm:$0x7f] }
 0x2ba   :  { %1554 = vrot.lane.b32.xlu1 %v1517_v51, %s2648_s21 }
 0x2bb   :  { %1283 = vrot.lane.b32.xlu0 %v1517_v51, %s2643_s11 }
 0x2be   :  { %1911 = vrot.lane.b32.xlu1 %v1880_v54, %s2652_s0 }
 0x2bf   :  { %1649 = vrot.lane.b32.xlu0 %v1613_v55, %s2649_s2 }
 0x2c2   :  { %1651 = vrot.lane.b32.xlu1 %v1614_v56, %s2649_s2  ;;  %v1620_v56 = vld [vmem:[#allocation4 + $0x59] sm:$0x7f] }
 0x2c3   :  { %1368 = vrot.lane.b32.xlu0 %v1335_v58, %s2644_s14  ;;  %v1340_v58 = vld [vmem:[#allocation4 + $0x59] sm:$0x7f] }
 0x2c6   :  { %1459 = vrot.lane.b32.xlu1 %v1421_v59, %s2646_s12 }
 0x2c7   :  { %1743 = vrot.lane.b32.xlu0 %v1711_v61, %s2650_s3 }
 0x2ca   :  { %1828 = vrot.lane.b32.xlu1 %v1517_v51, %s2651_s18  ;;  %v1885_v51 = vld [vmem:[#allocation4 + $0x51] sm:$0x7f] }
 0x2cb   :  { %1745 = vrot.lane.b32.xlu0 %v1712_v57, %s2650_s3  ;;  %v1341_v57 = vld [vmem:[#allocation4 + $0x61] sm:$0x7f] }
 0x2ce   :  { %1830 = vrot.lane.b32.xlu1 %v1797_v60, %s2651_s18 }
 0x2cf   :  { %1556 = vrot.lane.b32.xlu0 %v1797_v60, %s2648_s21 }
 0x2d2   :  { %1285 = vrot.lane.b32.xlu1 %v1797_v60, %s2643_s11  ;;  %v1716_v60 = vld [vmem:[#allocation4 + $0x58] sm:$0x7f] }
 0x2d3   :  { %1913 = vrot.lane.b32.xlu0 %v1881_v5, %s2652_s0 }
 0x2d6   :  { %1915 = vrot.lane.b32.xlu1 %v1882_v4, %s2652_s0 }
 0x2d7   :  { %1653 = vrot.lane.b32.xlu0 %v1615_v17, %s2649_s2 }
 0x2da   :  { %1370 = vrot.lane.b32.xlu1 %v1336_v2, %s2644_s14  ;;  %v1717_v2 = vld [vmem:[#allocation4 + $0x60] sm:$0x7f] }
 0x2db   :  { %1287 = vrot.lane.b32.xlu0 %v1252_v16, %s2643_s11 }
 0x2de   :  { %1372 = vrot.lane.b32.xlu1 %v1337_v29, %s2644_s14 }
 0x2df   :  { %1747 = vrot.lane.b32.xlu0 %v1713_v41, %s2650_s3 }
 0x2e2   :  { %1463 = vrot.lane.b32.xlu1 %v1423_v28, %s2646_s12  ;;  %v1428_v28 = vld [vmem:[#allocation4 + $0x68] sm:$0x7f] }
 0x2e3   :  { %1461 = vrot.lane.b32.xlu0 %v1422_v40, %s2646_s12 }
 0x2e4   :  { %v1276_v53 = vpop.permute.xlu1 %1275 }
 0x2e5   :  { %v1274_v63 = vpop.permute.xlu0 %1273  ;;  %1317 = vst.msk [vmem:[#allocation3 + $0x10] sm:$0xff] %vm1315_vm14, %v1276_v53 }
 0x2e6   :  { %1316 = vst.msk [vmem:[#allocation3 + $0x8] sm:$0xff] %vm1315_vm14, %v1274_v63  ;;  %1465 = vrot.lane.b32.xlu1 %v1424_v0, %s2646_s12 }
 0x2e7   :  { %1832 = vrot.lane.b32.xlu0 %v1798_v1, %s2651_s18 }
 0x2e8   :  { %v1448_v3 = vpop.permute.xlu1 %1447 }
 0x2e9   :  { %v1359_v6 = vpop.permute.xlu0 %1358  ;;  %1496 = vst.msk [vmem:[#allocation3 + $0x1] sm:$0x7f] %vm1495_vm15, %v1448_v3  ;;  %v1257_v3 = vld [vmem:[#allocation4 + $0x68] sm:$0xff] }
 0x2ea   :  { %1401 = vst.msk [vmem:[#allocation3 + $0x8] sm:$0x7f] %vm1400_vm0, %v1359_v6  ;;  %1560 = vrot.lane.b32.xlu1 %v1252_v16, %s2648_s21  ;;  %v1427_v16 = vld [vmem:[#allocation4 + $0x60] sm:$0x7f]  ;;  %v1886_v6 = vld [vmem:[#allocation4 + $0x59] sm:$0x7f] }
 0x2eb   :  { %1558 = vrot.lane.b32.xlu0 %v1798_v1, %s2648_s21 }
 0x2ec   :  { %v1361_v7 = vpop.permute.xlu1 %1360 }
 0x2ed   :  { %v1278_v8 = vpop.permute.xlu0 %1277  ;;  %1402 = vst.msk [vmem:[#allocation3 + $0x10] sm:$0x7f] %vm1400_vm0, %v1361_v7 }
 0x2ee   :  { %1318 = vst.msk [vmem:[#allocation3 + $0x18] sm:$0xff] %vm1315_vm14, %v1278_v8  ;;  %1289 = vrot.lane.b32.xlu1 %v1253_v9, %s2643_s11 }
 0x2ef   :  { %1917 = vrot.lane.b32.xlu0 %v1883_v10, %s2652_s0  ;;  %v1621_v10 = vld [vmem:[#allocation4 + $0x61] sm:$0x7f] }
 0x2f0   :  { %v1545_v11 = vpop.permute.xlu1 %1544 }
 0x2f1   :  { %v1450_v12 = vpop.permute.xlu0 %1449  ;;  %1593 = vst.msk [vmem:[#allocation3] sm:$0xff] %vm1592_vm1, %v1545_v11 }
 0x2f2   :  { %1497 = vst.msk [vmem:[#allocation3 + $0x9] sm:$0x7f] %vm1495_vm15, %v1450_v12  ;;  %1655 = vrot.lane.b32.xlu1 %v1616_v13, %s2649_s2  ;;  %v1342_v13 = vld [vmem:[#allocation4 + $0x69] sm:$0x7f] }
 0x2f3   :  { %1562 = vrot.lane.b32.xlu0 %v1253_v9, %s2648_s21 }
 0x2f4   :  { %v1452_v14 = vpop.permute.xlu1 %1451 }
 0x2f5   :  { %v1363_v15 = vpop.permute.xlu0 %1362  ;;  %1498 = vst.msk [vmem:[#allocation3 + $0x11] sm:$0x7f] %vm1495_vm15, %v1452_v14  ;;  %v1887_v14 = vld [vmem:[#allocation4 + $0x61] sm:$0x7f] }
 0x2f6   :  { %1403 = vst.msk [vmem:[#allocation3 + $0x18] sm:$0x7f] %vm1400_vm0, %v1363_v15  ;;  %1291 = vrot.lane.b32.xlu1 %v1254_v18, %s2643_s11 }
 0x2f7   :  { %1657 = vrot.lane.b32.xlu0 %v1617_v19, %s2649_s2 }
 0x2f8   :  { %v1642_v20 = vpop.permute.xlu1 %1641 }
 0x2f9   :  { %v1547_v21 = vpop.permute.xlu0 %1546  ;;  %1690 = vst.msk [vmem:[#allocation3] sm:$0x7f] %vm1689_vm2, %v1642_v20  ;;  %v1718_v20 = vld [vmem:[#allocation4 + $0x68] sm:$0x7f] }
 0x2fa   :  { %1594 = vst.msk [vmem:[#allocation3 + $0x8] sm:$0xff] %vm1592_vm1, %v1547_v21  ;;  %1659 = vrot.lane.b32.xlu1 %v1618_v22, %s2649_s2  ;;  %v1622_v21 = vld [vmem:[#allocation4 + $0x69] sm:$0x7f] }
 0x2fb   :  { %1374 = vrot.lane.b32.xlu0 %v1338_v23, %s2644_s14 }
 0x2fc   :  { %v1549_v24 = vpop.permute.xlu1 %1548 }
 0x2fd   :  { %v1454_v25 = vpop.permute.xlu0 %1453  ;;  %1595 = vst.msk [vmem:[#allocation3 + $0x10] sm:$0xff] %vm1592_vm1, %v1549_v24  ;;  %v1719_v24 = vld [vmem:[#allocation4 + $0x70] sm:$0x7f] }
 0x2fe   :  { %1499 = vst.msk [vmem:[#allocation3 + $0x19] sm:$0x7f] %vm1495_vm15, %v1454_v25  ;;  %1376 = vrot.lane.b32.xlu1 %v1339_v26, %s2644_s14  ;;  %v1429_v25 = vld [vmem:[#allocation4 + $0x70] sm:$0x7f] }
 0x2ff   :  { %1749 = vrot.lane.b32.xlu0 %v1714_v27, %s2650_s3 }
 0x300   :  { %v1736_v30 = vpop.permute.xlu1 %1735 }
 0x301   :  { %v1644_v31 = vpop.permute.xlu0 %1643  ;;  %1778 = vst.msk [vmem:[#allocation3 + $0x1] sm:$0x7f] %vm1777_vm3, %v1736_v30  ;;  %v1526_v30 = vld [vmem:[#allocation4 + $0x70] sm:$0xff] }
 0x302   :  { %1691 = vst.msk [vmem:[#allocation3 + $0x8] sm:$0x7f] %vm1689_vm2, %v1644_v31  ;;  %1751 = vrot.lane.b32.xlu1 %v1715_v32, %s2650_s3 }
 0x303   :  { %1467 = vrot.lane.b32.xlu0 %v1425_v33, %s2646_s12  ;;  %v1888_v33 = vld [vmem:[#allocation4 + $0x69] sm:$0x7f] }
 0x304   :  { %v1551_v34 = vpop.permute.xlu1 %1550 }
 0x305   :  { %v1280_v35 = vpop.permute.xlu0 %1279  ;;  %1596 = vst.msk [vmem:[#allocation3 + $0x18] sm:$0xff] %vm1592_vm1, %v1551_v34 }
 0x306   :  { %1319 = vst.msk [vmem:[#allocation3 + $0x20] sm:$0xff] %vm1315_vm14, %v1280_v35  ;;  %1469 = vrot.lane.b32.xlu1 %v1426_v36, %s2646_s12  ;;  %v1623_v36 = vld [vmem:[#allocation4 + $0x71] sm:$0x7f] }
 0x307   :  { %1834 = vrot.lane.b32.xlu0 %v1253_v9, %s2651_s18 }
 0x308   :  { %v1738_v37 = vpop.permute.xlu1 %1737 }
 0x309   :  { %v1646_v38 = vpop.permute.xlu0 %1645  ;;  %1779 = vst.msk [vmem:[#allocation3 + $0x9] sm:$0x7f] %vm1777_vm3, %v1738_v37 }
 0x30a   :  { %1692 = vst.msk [vmem:[#allocation3 + $0x10] sm:$0x7f] %vm1689_vm2, %v1646_v38  ;;  %1836 = vrot.lane.b32.xlu1 %v1254_v18, %s2651_s18 }
 0x30b   :  { %1564 = vrot.lane.b32.xlu0 %v1254_v18, %s2648_s21 }
 0x30c   :  { %v1282_v39 = vpop.permute.xlu1 %1281 }
 0x30d   :  { %v1821_v42 = vpop.permute.xlu0 %1820  ;;  %1320 = vst.msk [vmem:[#allocation3 + $0x28] sm:$0xff] %vm1315_vm14, %v1282_v39 }
 0x30e   :  { %1863 = vst.msk [vmem:[#allocation3] sm:$0xff] %vm1862_vm4, %v1821_v42  ;;  %1293 = vrot.lane.b32.xlu1 %v1255_v43, %s2643_s11  ;;  %v1343_v42 = vld [vmem:[#allocation4 + $0x71] sm:$0x7f] }
 0x30f   :  { %1919 = vrot.lane.b32.xlu0 %v1884_v44, %s2652_s0 }
 0x310   :  { %v1648_v45 = vpop.permute.xlu1 %1647 }
 0x311   :  { %v1365_v46 = vpop.permute.xlu0 %1364  ;;  %1693 = vst.msk [vmem:[#allocation3 + $0x18] sm:$0x7f] %vm1689_vm2, %v1648_v45 }
 0x312   :  { %1404 = vst.msk [vmem:[#allocation3 + $0x20] sm:$0x7f] %vm1400_vm0, %v1365_v46  ;;  %1661 = vrot.lane.b32.xlu1 %v1619_v47, %s2649_s2  ;;  %v1430_v47 = vld [vmem:[#allocation4 + $0x78] sm:$0x7f] }
 0x313   :  { %1566 = vrot.lane.b32.xlu0 %v1255_v43, %s2648_s21 }
 0x314   :  { %v1823_v48 = vpop.permute.xlu1 %1822 }
 0x315   :  { %v1740_v49 = vpop.permute.xlu0 %1739  ;;  %1864 = vst.msk [vmem:[#allocation3 + $0x8] sm:$0xff] %vm1862_vm4, %v1823_v48  ;;  %v1720_v48 = vld [vmem:[#allocation4 + $0x78] sm:$0x7f] }
 0x316   :  { %1780 = vst.msk [vmem:[#allocation3 + $0x11] sm:$0x7f] %vm1777_vm3, %v1740_v49  ;;  %1295 = vrot.lane.b32.xlu1 %v1256_v50, %s2643_s11 }
 0x317   :  { %1921 = vrot.lane.b32.xlu0 %v1885_v51, %s2652_s0  ;;  %v1527_v51 = vld [vmem:[#allocation4 + $0x78] sm:$0xff] }
 0x318   :  { %v1367_v54 = vpop.permute.xlu1 %1366 }
 0x319   :  { %v1906_v55 = vpop.permute.xlu0 %1905  ;;  %1405 = vst.msk [vmem:[#allocation3 + $0x28] sm:$0x7f] %vm1400_vm0, %v1367_v54 }
 0x31a   :  { %1948 = vst.msk [vmem:[#allocation3] sm:$0x7f] %vm1947_vm5, %v1906_v55  ;;  %1663 = vrot.lane.b32.xlu1 %v1620_v56, %s2649_s2  ;;  %v1624_v56 = vld [vmem:[#allocation4 + $0x79] sm:$0x7f] }
 0x31b   :  { %1378 = vrot.lane.b32.xlu0 %v1340_v58, %s2644_s14  ;;  %v1890_v58 = vld [vmem:[#allocation4 + $0x79] sm:$0x7f] }
 0x31c   :  { %v1742_v59 = vpop.permute.xlu1 %1741 }
 0x31d   :  { %v1456_v61 = vpop.permute.xlu0 %1455  ;;  %1781 = vst.msk [vmem:[#allocation3 + $0x19] sm:$0x7f] %vm1777_vm3, %v1742_v59 }
 0x31e   :  { %1500 = vst.msk [vmem:[#allocation3 + $0x21] sm:$0x7f] %vm1495_vm15, %v1456_v61  ;;  %1380 = vrot.lane.b32.xlu1 %v1341_v57, %s2644_s14 }
 0x31f   :  { %1753 = vrot.lane.b32.xlu0 %v1716_v60, %s2650_s3 }
 0x320   :  { %v1908_v5 = vpop.permute.xlu1 %1907 }
 0x321   :  { %v1825_v4 = vpop.permute.xlu0 %1824  ;;  %v1962_v17 = vld [vmem:[#allocation3] sm:$0xff]  ;;  %1949 = vst.msk [vmem:[#allocation3 + $0x8] sm:$0x7f] %vm1947_vm5, %v1908_v5 }
 0x322   :  { %1865 = vst.msk [vmem:[#allocation3 + $0x10] sm:$0xff] %vm1862_vm4, %v1825_v4  ;;  %2565 = vmatprep.mubr.msk.f32.mxu0 %vm43_vm12, %v1962_v17  ;;  %1755 = vrot.lane.b32.xlu1 %v1717_v2, %s2650_s3 }
 0x323   :  { %1471 = vrot.lane.b32.xlu0 %v1427_v16, %s2646_s12 }
 0x324   :  { %v1553_v29 = vpop.permute.xlu1 %1552 }
 0x325   :  { %v1458_v41 = vpop.permute.xlu0 %1457  ;;  %1597 = vst.msk [vmem:[#allocation3 + $0x20] sm:$0xff] %vm1592_vm1, %v1553_v29 }
 0x326   :  { %1501 = vst.msk [vmem:[#allocation3 + $0x29] sm:$0x7f] %vm1495_vm15, %v1458_v41  ;;  %1473 = vrot.lane.b32.xlu1 %v1428_v28, %s2646_s12 }
 0x327   :  { %1838 = vrot.lane.b32.xlu0 %v1255_v43, %s2651_s18  ;;  %v1889_v43 = vld [vmem:[#allocation4 + $0x71] sm:$0x7f] }
 0x328   :  { %v1910_v40 = vpop.permute.xlu1 %1909  ;;  %v1963_v63 = vld [vmem:[#allocation3 + $0x8] sm:$0xff] }
 0x329   :  { %v1827_v53 = vpop.permute.xlu0 %1826  ;;  %1950 = vst.msk [vmem:[#allocation3 + $0x10] sm:$0x7f] %vm1947_vm5, %v1910_v40  ;;  %2566 = vmatmul.mubr.msk.f32.vlgmr.msra.gmra.mrb[16].mxu0 %vm43_vm12, %v1963_v63 }
 0x32a   :  { %1866 = vst.msk [vmem:[#allocation3 + $0x18] sm:$0xff] %vm1862_vm4, %v1827_v53  ;;  %1840 = vrot.lane.b32.xlu1 %v1256_v50, %s2651_s18 }
 0x32b   :  { %1568 = vrot.lane.b32.xlu0 %v1256_v50, %s2648_s21 }
 0x32c   :  { %v1555_v0 = vpop.permute.xlu1 %1554 }
 0x32d   :  { %v1284_v1 = vpop.permute.xlu0 %1283  ;;  %1598 = vst.msk [vmem:[#allocation3 + $0x28] sm:$0xff] %vm1592_vm1, %v1555_v0 }
 0x32e   :  { %1321 = vst.msk [vmem:[#allocation3 + $0x30] sm:$0xff] %vm1315_vm14, %v1284_v1  ;;  %1297 = vrot.lane.b32.xlu1 %v1257_v3, %s2643_s11 }
 0x32f   :  { %1923 = vrot.lane.b32.xlu0 %v1886_v6, %s2652_s0 }
 0x330   :  { %v1912_v7 = vpop.permute.xlu1 %1911  ;;  %v1964_v9 = vld [vmem:[#allocation3 + $0x10] sm:$0xff] }
 0x331   :  { %v1650_v8 = vpop.permute.xlu0 %1649  ;;  %1951 = vst.msk [vmem:[#allocation3 + $0x18] sm:$0x7f] %vm1947_vm5, %v1912_v7  ;;  %2568 = vmatprep.mubr.msk.f32.mxu1 %vm43_vm12, %v1964_v9 }
 0x332   :  { %1694 = vst.msk [vmem:[#allocation3 + $0x20] sm:$0x7f] %vm1689_vm2, %v1650_v8  ;;  %1665 = vrot.lane.b32.xlu1 %v1621_v10, %s2649_s2 }
 0x333   :  { %1570 = vrot.lane.b32.xlu0 %v1257_v3, %s2648_s21 }
 0x334   :  { %v1652_v11 = vpop.permute.xlu1 %1651 }
 0x335   :  { %v1369_v12 = vpop.permute.xlu0 %1368  ;;  %1695 = vst.msk [vmem:[#allocation3 + $0x28] sm:$0x7f] %vm1689_vm2, %v1652_v11 }
 0x336   :  { %1406 = vst.msk [vmem:[#allocation3 + $0x30] sm:$0x7f] %vm1400_vm0, %v1369_v12  ;;  %1382 = vrot.lane.b32.xlu1 %v1342_v13, %s2644_s14 }
 0x337   :  { %1925 = vrot.lane.b32.xlu0 %v1887_v14, %s2652_s0 }
 0x338   :  { %v1460_v15 = vpop.permute.xlu1 %1459  ;;  %v1965_v19 = vld [vmem:[#allocation3 + $0x18] sm:$0xff] }
 0x339   :  { %v1744_v18 = vpop.permute.xlu0 %1743  ;;  %1502 = vst.msk [vmem:[#allocation3 + $0x31] sm:$0x7f] %vm1495_vm15, %v1460_v15  ;;  %2569 = vmatmul.mubr.msk.f32.vlgmr.msra.gmra.mrb[0].mxu1 %vm43_vm12, %v1965_v19 }
 0x33a   :  { %1782 = vst.msk [vmem:[#allocation3 + $0x21] sm:$0x7f] %vm1777_vm3, %v1744_v18  ;;  %1757 = vrot.lane.b32.xlu1 %v1718_v20, %s2650_s3 }
 0x33b   :  { %1667 = vrot.lane.b32.xlu0 %v1622_v21, %s2649_s2 }
 0x33c   :  { %v1829_v22 = vpop.permute.xlu1 %1828 }
 0x33d   :  { %v1746_v23 = vpop.permute.xlu0 %1745  ;;  %1867 = vst.msk [vmem:[#allocation3 + $0x20] sm:$0xff] %vm1862_vm4, %v1829_v22 }
 0x33e   :  { %1783 = vst.msk [vmem:[#allocation3 + $0x29] sm:$0x7f] %vm1777_vm3, %v1746_v23  ;;  %1759 = vrot.lane.b32.xlu1 %v1719_v24, %s2650_s3 }
 0x33f   :  { %1475 = vrot.lane.b32.xlu0 %v1429_v25, %s2646_s12 }
 0x340   :  { %v1831_v26 = vpop.permute.xlu1 %1830 }
 0x341   :  { %v1557_v27 = vpop.permute.xlu0 %1556  ;;  %1868 = vst.msk [vmem:[#allocation3 + $0x28] sm:$0xff] %vm1862_vm4, %v1831_v26 }
 0x342   :  { %1599 = vst.msk [vmem:[#allocation3 + $0x30] sm:$0xff] %vm1592_vm1, %v1557_v27  ;;  %1572 = vrot.lane.b32.xlu1 %v1526_v30, %s2648_s21 }
 0x343   :  { %1842 = vrot.lane.b32.xlu0 %v1257_v3, %s2651_s18 }
 0x344   :  { %v1286_v31 = vpop.permute.xlu1 %1285 }
 0x345   :  { %v1914_v32 = vpop.permute.xlu0 %1913  ;;  %1322 = vst.msk [vmem:[#allocation3 + $0x38] sm:$0xff] %vm1315_vm14, %v1286_v31 }
 0x346   :  { %1952 = vst.msk [vmem:[#allocation3 + $0x20] sm:$0x7f] %vm1947_vm5, %v1914_v32  ;;  %1927 = vrot.lane.b32.xlu1 %v1888_v33, %s2652_s0 }
 0x347   :  { %1844 = vrot.lane.b32.xlu0 %v1526_v30, %s2651_s18 }
 0x348   :  { %v1916_v34 = vpop.permute.xlu1 %1915 }
 0x349   :  { %v1654_v35 = vpop.permute.xlu0 %1653  ;;  %1953 = vst.msk [vmem:[#allocation3 + $0x28] sm:$0x7f] %vm1947_vm5, %v1916_v34 }
 0x34a   :  { %1696 = vst.msk [vmem:[#allocation3 + $0x30] sm:$0x7f] %vm1689_vm2, %v1654_v35  ;;  %1669 = vrot.lane.b32.xlu1 %v1623_v36, %s2649_s2 }
 0x34b   :  { %1299 = vrot.lane.b32.xlu0 %v1526_v30, %s2643_s11 }
 0x34c   :  { %v1371_v37 = vpop.permute.xlu1 %1370 }
 0x34d   :  { %v1288_v38 = vpop.permute.xlu0 %1287  ;;  %v1966_v39 = vld [vmem:[#allocation3 + $0x20] sm:$0xff]  ;;  %1407 = vst.msk [vmem:[#allocation3 + $0x38] sm:$0x7f] %vm1400_vm0, %v1371_v37 }
 0x34e   :  { %1323 = vst.msk [vmem:[#allocation3 + $0x48] sm:$0xff] %vm1315_vm14, %v1288_v38  ;;  %2571 = vmatprep.mubr.msk.f32.mxu1 %vm43_vm12, %v1966_v39  ;;  %1384 = vrot.lane.b32.xlu1 %v1343_v42, %s2644_s14 }
 0x34f   :  { %1929 = vrot.lane.b32.xlu0 %v1889_v43, %s2652_s0 }
 0x350   :  { %v1373_v44 = vpop.permute.xlu1 %1372  ;;  %v1967_v46 = vld [vmem:[#allocation3 + $0x28] sm:$0xff] }
 0x351   :  { %v1748_v45 = vpop.permute.xlu0 %1747  ;;  %1408 = vst.msk [vmem:[#allocation3 + $0x48] sm:$0x7f] %vm1400_vm0, %v1373_v44  ;;  %2572 = vmatmul.mubr.msk.f32.gmra.mrb[2].mxu1 %vm43_vm12, %v1967_v46 }
 0x352   :  { %1784 = vst.msk [vmem:[#allocation3 + $0x31] sm:$0x7f] %vm1777_vm3, %v1748_v45  ;;  %1477 = vrot.lane.b32.xlu1 %v1430_v47, %s2646_s12 }
 0x353   :  { %1761 = vrot.lane.b32.xlu0 %v1720_v48, %s2650_s3 }
 0x354   :  { %v1464_v49 = vpop.permute.xlu1 %1463 }
 0x355   :  { %v1462_v50 = vpop.permute.xlu0 %1461  ;;  %1504 = vst.msk [vmem:[#allocation3 + $0x41] sm:$0x7f] %vm1495_vm15, %v1464_v49 }
 0x356   :  { %1503 = vst.msk [vmem:[#allocation3 + $0x39] sm:$0x7f] %vm1495_vm15, %v1462_v50  ;;  %1574 = vrot.lane.b32.xlu1 %v1527_v51, %s2648_s21 }
 0x357   :  { %1846 = vrot.lane.b32.xlu0 %v1527_v51, %s2651_s18 }
 0x358   :  { %v1466_v54 = vpop.permute.xlu1 %1465 }
 0x359   :  { %v1833_v55 = vpop.permute.xlu0 %1832  ;;  %1505 = vst.msk [vmem:[#allocation3 + $0x49] sm:$0x7f] %vm1495_vm15, %v1466_v54 }
 0x35a   :  { %1869 = vst.msk [vmem:[#allocation3 + $0x30] sm:$0xff] %vm1862_vm4, %v1833_v55  ;;  %1671 = vrot.lane.b32.xlu1 %v1624_v56, %s2649_s2 }
 0x35b   :  { %1931 = vrot.lane.b32.xlu0 %v1890_v58, %s2652_s0 }
 0x35c   :  { %v1561_v59 = vpop.permute.xlu1 %1560 }
 0x35d   :  { %v1559_v61 = vpop.permute.xlu0 %1558  ;;  %1601 = vst.msk [vmem:[#allocation3 + $0x40] sm:$0xff] %vm1592_vm1, %v1561_v59 }
 0x35e   :  { %1600 = vst.msk [vmem:[#allocation3 + $0x38] sm:$0xff] %vm1592_vm1, %v1559_v61 }
 0x360   :  { %v1290_v57 = vpop.permute.xlu1 %1289 }
 0x361   :  { %v1918_v60 = vpop.permute.xlu0 %1917  ;;  %1324 = vst.msk [vmem:[#allocation3 + $0x50] sm:$0xff] %vm1315_vm14, %v1290_v57 }
 0x362   :  { %1954 = vst.msk [vmem:[#allocation3 + $0x30] sm:$0x7f] %vm1947_vm5, %v1918_v60 }
 0x364   :  { %v1656_v5 = vpop.permute.xlu1 %1655 }
 0x365   :  { %v1563_v4 = vpop.permute.xlu0 %1562  ;;  %1697 = vst.msk [vmem:[#allocation3 + $0x38] sm:$0x7f] %vm1689_vm2, %v1656_v5 }
 0x366   :  { %1602 = vst.msk [vmem:[#allocation3 + $0x48] sm:$0xff] %vm1592_vm1, %v1563_v4 }
 0x368   :  { %v1292_v17 = vpop.permute.xlu1 %1291 }
 0x369   :  { %v1658_v2 = vpop.permute.xlu0 %1657  ;;  %v1968_v16 = vld [vmem:[#allocation3 + $0x30] sm:$0xff]  ;;  %1325 = vst.msk [vmem:[#allocation3 + $0x58] sm:$0xff] %vm1315_vm14, %v1292_v17 }
 0x36a   :  { %1698 = vst.msk [vmem:[#allocation3 + $0x40] sm:$0x7f] %vm1689_vm2, %v1658_v2  ;;  %2574 = vmatprep.mubr.msk.f32.mxu1 %vm43_vm12, %v1968_v16 }
 0x36c   :  { %v1660_v29 = vpop.permute.xlu1 %1659  ;;  %v1969_v28 = vld [vmem:[#allocation3 + $0x38] sm:$0xff] }
 0x36d   :  { %v1375_v41 = vpop.permute.xlu0 %1374  ;;  %1699 = vst.msk [vmem:[#allocation3 + $0x48] sm:$0x7f] %vm1689_vm2, %v1660_v29  ;;  %2575 = vmatmul.mubr.msk.f32.gmra.mrb[4].mxu1 %vm43_vm12, %v1969_v28 }
 0x36e   :  { %1409 = vst.msk [vmem:[#allocation3 + $0x50] sm:$0x7f] %vm1400_vm0, %v1375_v41 }
 0x370   :  { %v1377_v40 = vpop.permute.xlu1 %1376 }
 0x371   :  { %v1750_v53 = vpop.permute.xlu0 %1749  ;;  %1410 = vst.msk [vmem:[#allocation3 + $0x58] sm:$0x7f] %vm1400_vm0, %v1377_v40 }
 0x372   :  { %1785 = vst.msk [vmem:[#allocation3 + $0x41] sm:$0x7f] %vm1777_vm3, %v1750_v53 }
 0x374   :  { %v1752_v63 = vpop.permute.xlu1 %1751 }
 0x375   :  { %v1468_v0 = vpop.permute.xlu0 %1467  ;;  %1786 = vst.msk [vmem:[#allocation3 + $0x49] sm:$0x7f] %vm1777_vm3, %v1752_v63 }
 0x376   :  { %1506 = vst.msk [vmem:[#allocation3 + $0x51] sm:$0x7f] %vm1495_vm15, %v1468_v0 }
 0x378   :  { %v1470_v1 = vpop.permute.xlu1 %1469 }
 0x379   :  { %v1835_v3 = vpop.permute.xlu0 %1834  ;;  %1507 = vst.msk [vmem:[#allocation3 + $0x59] sm:$0x7f] %vm1495_vm15, %v1470_v1 }
 0x37a   :  { %1870 = vst.msk [vmem:[#allocation3 + $0x40] sm:$0xff] %vm1862_vm4, %v1835_v3 }
 0x37c   :  { %v1837_v6 = vpop.permute.xlu1 %1836 }
 0x37d   :  { %v1565_v7 = vpop.permute.xlu0 %1564  ;;  %1871 = vst.msk [vmem:[#allocation3 + $0x48] sm:$0xff] %vm1862_vm4, %v1837_v6 }
 0x37e   :  { %1603 = vst.msk [vmem:[#allocation3 + $0x50] sm:$0xff] %vm1592_vm1, %v1565_v7 }
 0x380   :  { %v1294_v8 = vpop.permute.xlu1 %1293 }
 0x381   :  { %v1920_v9 = vpop.permute.xlu0 %1919  ;;  %1326 = vst.msk [vmem:[#allocation3 + $0x60] sm:$0xff] %vm1315_vm14, %v1294_v8 }
 0x382   :  { %1955 = vst.msk [vmem:[#allocation3 + $0x40] sm:$0x7f] %vm1947_vm5, %v1920_v9 }
 0x384   :  { %v1662_v10 = vpop.permute.xlu1 %1661 }
 0x385   :  { %v1567_v11 = vpop.permute.xlu0 %1566  ;;  %1700 = vst.msk [vmem:[#allocation3 + $0x50] sm:$0x7f] %vm1689_vm2, %v1662_v10 }
 0x386   :  { %1604 = vst.msk [vmem:[#allocation3 + $0x58] sm:$0xff] %vm1592_vm1, %v1567_v11 }
 0x388   :  { %v1296_v12 = vpop.permute.xlu1 %1295 }
 0x389   :  { %v1922_v13 = vpop.permute.xlu0 %1921  ;;  %v1970_v14 = vld [vmem:[#allocation3 + $0x40] sm:$0xff]  ;;  %1327 = vst.msk [vmem:[#allocation3 + $0x68] sm:$0xff] %vm1315_vm14, %v1296_v12 }
 0x38a   :  { %1956 = vst.msk [vmem:[#allocation3 + $0x48] sm:$0x7f] %vm1947_vm5, %v1922_v13  ;;  %2577 = vmatprep.mubr.msk.f32.mxu1 %vm43_vm12, %v1970_v14 }
 0x38c   :  { %v1664_v15 = vpop.permute.xlu1 %1663 }
 0x38d   :  { %v1379_v18 = vpop.permute.xlu0 %1378  ;;  %1701 = vst.msk [vmem:[#allocation3 + $0x58] sm:$0x7f] %vm1689_vm2, %v1664_v15 }
 0x38e   :  { %1411 = vst.msk [vmem:[#allocation3 + $0x60] sm:$0x7f] %vm1400_vm0, %v1379_v18 }
 0x390   :  { %v1381_v19 = vpop.permute.xlu1 %1380 }
 0x391   :  { %v1754_v20 = vpop.permute.xlu0 %1753  ;;  %v1971_v21 = vld [vmem:[#allocation3 + $0x48] sm:$0xff]  ;;  %1412 = vst.msk [vmem:[#allocation3 + $0x68] sm:$0x7f] %vm1400_vm0, %v1381_v19 }
 0x392   :  { %1787 = vst.msk [vmem:[#allocation3 + $0x51] sm:$0x7f] %vm1777_vm3, %v1754_v20  ;;  %2578 = vmatmul.mubr.msk.f32.gmra.mrb[6].mxu1 %vm43_vm12, %v1971_v21 }
 0x394   :  { %v1756_v22 = vpop.permute.xlu1 %1755 }
 0x395   :  { %v1472_v23 = vpop.permute.xlu0 %1471  ;;  %1788 = vst.msk [vmem:[#allocation3 + $0x59] sm:$0x7f] %vm1777_vm3, %v1756_v22 }
 0x396   :  { %1508 = vst.msk [vmem:[#allocation3 + $0x61] sm:$0x7f] %vm1495_vm15, %v1472_v23 }
 0x398   :  { %v1474_v24 = vpop.permute.xlu1 %1473 }
 0x399   :  { %v1839_v25 = vpop.permute.xlu0 %1838  ;;  %1509 = vst.msk [vmem:[#allocation3 + $0x69] sm:$0x7f] %vm1495_vm15, %v1474_v24 }
 0x39a   :  { %1872 = vst.msk [vmem:[#allocation3 + $0x50] sm:$0xff] %vm1862_vm4, %v1839_v25 }
 0x39c   :  { %v1841_v26 = vpop.permute.xlu1 %1840 }
 0x39d   :  { %v1569_v27 = vpop.permute.xlu0 %1568  ;;  %1873 = vst.msk [vmem:[#allocation3 + $0x58] sm:$0xff] %vm1862_vm4, %v1841_v26 }
 0x39e   :  { %1605 = vst.msk [vmem:[#allocation3 + $0x60] sm:$0xff] %vm1592_vm1, %v1569_v27 }
 0x3a0   :  { %v1298_v30 = vpop.permute.xlu1 %1297 }
 0x3a1   :  { %v1924_v31 = vpop.permute.xlu0 %1923  ;;  %1328 = vst.msk [vmem:[#allocation3 + $0x70] sm:$0xff] %vm1315_vm14, %v1298_v30 }
 0x3a2   :  { %1957 = vst.msk [vmem:[#allocation3 + $0x50] sm:$0x7f] %vm1947_vm5, %v1924_v31 }
 0x3a4   :  { %v1666_v32 = vpop.permute.xlu1 %1665 }
 0x3a5   :  { %v1571_v33 = vpop.permute.xlu0 %1570  ;;  %1702 = vst.msk [vmem:[#allocation3 + $0x60] sm:$0x7f] %vm1689_vm2, %v1666_v32 }
 0x3a6   :  { %1606 = vst.msk [vmem:[#allocation3 + $0x68] sm:$0xff] %vm1592_vm1, %v1571_v33 }
 0x3a8   :  { %v1383_v34 = vpop.permute.xlu1 %1382 }
 0x3a9   :  { %v1926_v35 = vpop.permute.xlu0 %1925  ;;  %v1972_v36 = vld [vmem:[#allocation3 + $0x50] sm:$0xff]  ;;  %1413 = vst.msk [vmem:[#allocation3 + $0x70] sm:$0x7f] %vm1400_vm0, %v1383_v34 }
 0x3aa   :  { %1958 = vst.msk [vmem:[#allocation3 + $0x58] sm:$0x7f] %vm1947_vm5, %v1926_v35  ;;  %2580 = vmatprep.mubr.msk.f32.mxu1 %vm43_vm12, %v1972_v36 }
 0x3ac   :  { %v1758_v37 = vpop.permute.xlu1 %1757 }
 0x3ad   :  { %v1668_v38 = vpop.permute.xlu0 %1667  ;;  %1789 = vst.msk [vmem:[#allocation3 + $0x61] sm:$0x7f] %vm1777_vm3, %v1758_v37 }
 0x3ae   :  { %1703 = vst.msk [vmem:[#allocation3 + $0x68] sm:$0x7f] %vm1689_vm2, %v1668_v38 }
 0x3b0   :  { %v1760_v39 = vpop.permute.xlu1 %1759 }
 0x3b1   :  { %v1476_v42 = vpop.permute.xlu0 %1475  ;;  %v1973_v43 = vld [vmem:[#allocation3 + $0x58] sm:$0xff]  ;;  %1790 = vst.msk [vmem:[#allocation3 + $0x69] sm:$0x7f] %vm1777_vm3, %v1760_v39 }
 0x3b2   :  { %1510 = vst.msk [vmem:[#allocation3 + $0x71] sm:$0x7f] %vm1495_vm15, %v1476_v42  ;;  %2581 = vmatmul.mubr.msk.f32.gmra.mrb[8].mxu1 %vm43_vm12, %v1973_v43 }
 0x3b4   :  { %v1573_v44 = vpop.permute.xlu1 %1572 }
 0x3b5   :  { %v1843_v45 = vpop.permute.xlu0 %1842  ;;  %1607 = vst.msk [vmem:[#allocation3 + $0x70] sm:$0xff] %vm1592_vm1, %v1573_v44 }
 0x3b6   :  { %1874 = vst.msk [vmem:[#allocation3 + $0x60] sm:$0xff] %vm1862_vm4, %v1843_v45 }
 0x3b8   :  { %v1928_v46 = vpop.permute.xlu1 %1927 }
 0x3b9   :  { %v1845_v47 = vpop.permute.xlu0 %1844  ;;  %1959 = vst.msk [vmem:[#allocation3 + $0x60] sm:$0x7f] %vm1947_vm5, %v1928_v46 }
 0x3ba   :  { %1875 = vst.msk [vmem:[#allocation3 + $0x68] sm:$0xff] %vm1862_vm4, %v1845_v47 }
 0x3bc   :  { %v1670_v48 = vpop.permute.xlu1 %1669 }
 0x3bd   :  { %v1300_v49 = vpop.permute.xlu0 %1299  ;;  %1704 = vst.msk [vmem:[#allocation3 + $0x70] sm:$0x7f] %vm1689_vm2, %v1670_v48 }
 0x3be   :  { %1329 = vst.msk [vmem:[#allocation3 + $0x78] sm:$0xff] %vm1315_vm14, %v1300_v49 }
 0x3c0   :  { %v1385_v50 = vpop.permute.xlu1 %1384  ;;  %v1974_v54 = vld [vmem:[#allocation3 + $0x60] sm:$0xff] }
 0x3c1   :  { %v1930_v51 = vpop.permute.xlu0 %1929  ;;  %1414 = vst.msk [vmem:[#allocation3 + $0x78] sm:$0x7f] %vm1400_vm0, %v1385_v50  ;;  %2583 = vmatprep.mubr.msk.f32.mxu1 %vm43_vm12, %v1974_v54 }
 0x3c2   :  { %1960 = vst.msk [vmem:[#allocation3 + $0x68] sm:$0x7f] %vm1947_vm5, %v1930_v51 }
 0x3c4   :  { %v1478_v55 = vpop.permute.xlu1 %1477 }
 0x3c5   :  { %v1762_v56 = vpop.permute.xlu0 %1761  ;;  %1511 = vst.msk [vmem:[#allocation3 + $0x79] sm:$0x7f] %vm1495_vm15, %v1478_v55 }
 0x3c6   :  { %1791 = vst.msk [vmem:[#allocation3 + $0x71] sm:$0x7f] %vm1777_vm3, %v1762_v56 }
 0x3c8   :  { %v1575_v58 = vpop.permute.xlu1 %1574 }
 0x3c9   :  { %v1847_v59 = vpop.permute.xlu0 %1846  ;;  %v1975_v61 = vld [vmem:[#allocation3 + $0x68] sm:$0xff]  ;;  %1608 = vst.msk [vmem:[#allocation3 + $0x78] sm:$0xff] %vm1592_vm1, %v1575_v58 }
 0x3ca   :  { %1876 = vst.msk [vmem:[#allocation3 + $0x70] sm:$0xff] %vm1862_vm4, %v1847_v59  ;;  %2584 = vmatmul.mubr.msk.f32.gmra.mrb[10].mxu1 %vm43_vm12, %v1975_v61 }
 0x3cc   :  { %v1672_v57 = vpop.permute.xlu1 %1671 }
 0x3cd   :  { %v1932_v60 = vpop.permute.xlu0 %1931  ;;  %1705 = vst.msk [vmem:[#allocation3 + $0x78] sm:$0x7f] %vm1689_vm2, %v1672_v57 }
 0x3ce   :  { %1961 = vst.msk [vmem:[#allocation3 + $0x70] sm:$0x7f] %vm1947_vm5, %v1932_v60 }
 0x3d4   :  { %v1977_v4 = vld [vmem:[#allocation3 + $0x78] sm:$0xff] }
 0x3d5   :  { %v1976_v5 = vld [vmem:[#allocation3 + $0x70] sm:$0xff] }
 0x3d6   :  { %2586 = vmatprep.mubr.msk.f32.mxu1 %vm43_vm12, %v1976_v5 }
 0x3d7   :  { %2587 = vmatmul.mubr.msk.f32.gmra.mrb[12].mxu1 %vm43_vm12, %v1977_v4 }
 0x3fc   :  { %v3827_v17 = vpop.f32.mrb[16].mxu0 }
 0x3fd   :  { %v2183_v2 = vsel %vm1027_vm11, %v3827_v17, 0.0  ;;  %v2220_v16 = vmul.f32 %v3827_v17, %v3827_v17  ;;  %v3833_v29 = vpop.f32.mrb[17].mxu0 }
 0x3fe   :  { %v2182_v41 = vsel %vm1027_vm11, %v3833_v29, 0.0  ;;  %v2219_v28 = vmul.f32 %v3833_v29, %v3833_v29 }
 0x3ff   :  { %v2236_v40 = vsel %vm1027_vm11, %v2220_v16, 0.0  ;;  %v2184_v53 = vadd.f32 %v2183_v2, %v2182_v41 }
 0x400   :  { %v2235_v63 = vsel %vm1027_vm11, %v2219_v28, 0.0 }
 0x401   :  { %v2237_v0 = vadd.f32 %v2236_v40, %v2235_v63 }
 0x40c   :  { %v3841_v1 = vpop.f32.mrb[0].mxu1 }
 0x40d   :  { %v3843_v3 = vpop.f32.mrb[1].mxu1  ;;  %v2222_v6 = vmul.f32 %v3841_v1, %v3841_v1  ;;  %v2187_v10 = vsel %vm1027_vm11, %v3841_v1, 0.0 }
 0x40e   :  { %v2185_v7 = vsel %vm1027_vm11, %v3843_v3, 0.0  ;;  %v2221_v8 = vmul.f32 %v3843_v3, %v3843_v3 }
 0x40f   :  { %v2186_v9 = vadd.f32 %v2185_v7, %v2184_v53  ;;  %v2240_v14 = vsel %vm1027_vm11, %v2222_v6, 0.0 }
 0x410   :  { %v2238_v11 = vsel %vm1027_vm11, %v2221_v8, 0.0 }
 0x411   :  { %v2239_v12 = vadd.f32 %v2238_v11, %v2237_v0  ;;  %v2188_v13 = vadd.f32 %v2187_v10, %v2186_v9 }
 0x413   :  { %v2241_v15 = vadd.f32 %v2240_v14, %v2239_v12 }
 0x424   :  { %v3855_v18 = vpop.f32.mrb[2].mxu1 }
 0x425   :  { %v3857_v19 = vpop.f32.mrb[3].mxu1  ;;  %v2224_v20 = vmul.f32 %v3855_v18, %v3855_v18  ;;  %v2191_v24 = vsel %vm1027_vm11, %v3855_v18, 0.0 }
 0x426   :  { %v2189_v21 = vsel %vm1027_vm11, %v3857_v19, 0.0  ;;  %v2223_v22 = vmul.f32 %v3857_v19, %v3857_v19 }
 0x427   :  { %v2190_v23 = vadd.f32 %v2189_v21, %v2188_v13  ;;  %v2244_v30 = vsel %vm1027_vm11, %v2224_v20, 0.0 }
 0x428   :  { %v2242_v25 = vsel %vm1027_vm11, %v2223_v22, 0.0 }
 0x429   :  { %v2243_v26 = vadd.f32 %v2242_v25, %v2241_v15  ;;  %v2192_v27 = vadd.f32 %v2191_v24, %v2190_v23 }
 0x42b   :  { %v2245_v31 = vadd.f32 %v2244_v30, %v2243_v26 }
 0x440   :  { %v3869_v32 = vpop.f32.mrb[4].mxu1 }
 0x441   :  { %v3871_v33 = vpop.f32.mrb[5].mxu1  ;;  %v2226_v34 = vmul.f32 %v3869_v32, %v3869_v32  ;;  %v2195_v38 = vsel %vm1027_vm11, %v3869_v32, 0.0 }
 0x442   :  { %v2193_v35 = vsel %vm1027_vm11, %v3871_v33, 0.0  ;;  %v2225_v36 = vmul.f32 %v3871_v33, %v3871_v33 }
 0x443   :  { %v2194_v37 = vadd.f32 %v2193_v35, %v2192_v27  ;;  %v2248_v44 = vsel %vm1027_vm11, %v2226_v34, 0.0 }
 0x444   :  { %v2246_v39 = vsel %vm1027_vm11, %v2225_v36, 0.0 }
 0x445   :  { %v2247_v42 = vadd.f32 %v2246_v39, %v2245_v31  ;;  %v2196_v43 = vadd.f32 %v2195_v38, %v2194_v37 }
 0x447   :  { %v2249_v45 = vadd.f32 %v2248_v44, %v2247_v42 }
 0x465   :  { %v3883_v46 = vpop.f32.mrb[6].mxu1 }
 0x466   :  { %v3885_v47 = vpop.f32.mrb[7].mxu1  ;;  %v2228_v48 = vmul.f32 %v3883_v46, %v3883_v46  ;;  %v2199_v54 = vsel %vm1027_vm11, %v3883_v46, 0.0 }
 0x467   :  { %v2197_v49 = vsel %vm1027_vm11, %v3885_v47, 0.0  ;;  %v2227_v50 = vmul.f32 %v3885_v47, %v3885_v47 }
 0x468   :  { %v2198_v51 = vadd.f32 %v2197_v49, %v2196_v43  ;;  %v2252_v59 = vsel %vm1027_vm11, %v2228_v48, 0.0 }
 0x469   :  { %v2250_v55 = vsel %vm1027_vm11, %v2227_v50, 0.0 }
 0x46a   :  { %v2251_v56 = vadd.f32 %v2250_v55, %v2249_v45  ;;  %v2200_v58 = vadd.f32 %v2199_v54, %v2198_v51 }
 0x46c   :  { %v2253_v61 = vadd.f32 %v2252_v59, %v2251_v56 }
 0x485   :  { %v3897_v57 = vpop.f32.mrb[8].mxu1 }
 0x486   :  { %v3899_v60 = vpop.f32.mrb[9].mxu1  ;;  %v2230_v5 = vmul.f32 %v3897_v57, %v3897_v57  ;;  %v2203_v41 = vsel %vm1027_vm11, %v3897_v57, 0.0 }
 0x487   :  { %v2201_v4 = vsel %vm1027_vm11, %v3899_v60, 0.0  ;;  %v2229_v2 = vmul.f32 %v3899_v60, %v3899_v60 }
 0x488   :  { %v2202_v16 = vadd.f32 %v2201_v4, %v2200_v58  ;;  %v2256_v63 = vsel %vm1027_vm11, %v2230_v5, 0.0 }
 0x489   :  { %v2254_v28 = vsel %vm1027_vm11, %v2229_v2, 0.0 }
 0x48a   :  { %v2255_v40 = vadd.f32 %v2254_v28, %v2253_v61  ;;  %v2204_v53 = vadd.f32 %v2203_v41, %v2202_v16 }
 0x48c   :  { %v2257_v0 = vadd.f32 %v2256_v63, %v2255_v40 }
 0x49d   :  { %v3911_v6 = vpop.f32.mrb[10].mxu1 }
 0x49e   :  { %v3913_v7 = vpop.f32.mrb[11].mxu1  ;;  %v2232_v8 = vmul.f32 %v3911_v6, %v3911_v6  ;;  %v2207_v12 = vsel %vm1027_vm11, %v3911_v6, 0.0 }
 0x49f   :  { %v2205_v9 = vsel %vm1027_vm11, %v3913_v7, 0.0  ;;  %v2231_v10 = vmul.f32 %v3913_v7, %v3913_v7 }
 0x4a0   :  { %v2206_v11 = vadd.f32 %v2205_v9, %v2204_v53  ;;  %v2260_v20 = vsel %vm1027_vm11, %v2232_v8, 0.0 }
 0x4a1   :  { %v2258_v13 = vsel %vm1027_vm11, %v2231_v10, 0.0 }
 0x4a2   :  { %v2259_v14 = vadd.f32 %v2258_v13, %v2257_v0  ;;  %v2208_v15 = vadd.f32 %v2207_v12, %v2206_v11 }
 0x4a4   :  { %v2261_v21 = vadd.f32 %v2260_v20, %v2259_v14 }
 0x4aa   :  { %v3925_v22 = vpop.f32.mrb[12].mxu1 }
 0x4ab   :  { %v2171_v23 = vpop.f32.mrb[13].mxu1  ;;  %v2234_v24 = vmul.f32 %v3925_v22, %v3925_v22  ;;  %v2211_v30 = vsel %vm1027_vm11, %v3925_v22, 0.0 }
 0x4ac   :  { %v2209_v25 = vsel %vm1027_vm11, %v2171_v23, 0.0  ;;  %v2233_v26 = vmul.f32 %v2171_v23, %v2171_v23 }
 0x4ad   :  { %v2210_v27 = vadd.f32 %v2209_v25, %v2208_v15  ;;  %v2264_v36 = vsel %vm1027_vm11, %v2234_v24, 0.0 }
 0x4ae   :  { %v2262_v31 = vsel %vm1027_vm11, %v2233_v26, 0.0 }
 0x4af   :  { %v2212_v34 = vadd.f32 %v2211_v30, %v2210_v27  ;;  %v2263_v35 = vadd.f32 %v2262_v31, %v2261_v21 }
 0x4b1   :  { %v2213_v37 = vrot.slane %v2212_v34, 4  ;;  %v2265_v38 = vadd.f32 %v2264_v36, %v2263_v35 }
 0x4b3   :  { %v2214_v39 = vadd.f32 %v2213_v37, %v2212_v34  ;;  %v2266_v42 = vrot.slane %v2265_v38, 4 }
 0x4b5   :  { %v2215_v43 = vrot.slane %v2214_v39, 2  ;;  %v2267_v44 = vadd.f32 %v2266_v42, %v2265_v38 }
 0x4b7   :  { %v2216_v45 = vadd.f32 %v2215_v43, %v2214_v39  ;;  %v2268_v48 = vrot.slane %v2267_v44, 2 }
 0x4b9   :  { %v2217_v49 = vrot.slane %v2216_v45, 1  ;;  %v2269_v50 = vadd.f32 %v2268_v48, %v2267_v44 }
 0x4bb   :  { %v2218_v51 = vadd.f32 %v2217_v49, %v2216_v45  ;;  %v2270_v54 = vrot.slane %v2269_v50, 1 }
 0x4bd   :  { %v2271_v55 = vadd.f32 %v2270_v54, %v2269_v50  ;;  %v2272_v56 = vmul.f32 0.0078125, %v2218_v51 }
 0x4bf   :  { %v2273_v58 = vmul.f32 0.0078125, %v2271_v55  ;;  %v2274_v59 = vmul.f32 %v2272_v56, %v2272_v56  ;;  %v2293_v61 = vsub.f32 %v2171_v23, %v2272_v56  ;;  %v2279_v5 = vsub.f32 %v3833_v29, %v2272_v56 }
 0x4c0   :  { %v2280_v4 = vsub.f32 %v3827_v17, %v2272_v56  ;;  %v2281_v2 = vsub.f32 %v3843_v3, %v2272_v56  ;;  %v2282_v16 = vsub.f32 %v3841_v1, %v2272_v56  ;;  %v2283_v41 = vsub.f32 %v3857_v19, %v2272_v56 }
 0x4c1   :  { %v2275_v28 = vsub.f32 %v2273_v58, %v2274_v59  ;;  %v2284_v40 = vsub.f32 %v3855_v18, %v2272_v56  ;;  %v2285_v53 = vsub.f32 %v3871_v33, %v2272_v56  ;;  %v2286_v63 = vsub.f32 %v3869_v32, %v2272_v56  ;;  %v2180_v18 = vld [vmem:[%s3965_s5] sm:$0x1] }
 0x4c2   :  { %v2287_v0 = vsub.f32 %v3885_v47, %v2272_v56  ;;  %v2288_v8 = vsub.f32 %v3883_v46, %v2272_v56  ;;  %v2289_v29 = vsub.f32 %v3899_v60, %v2272_v56  ;;  %v2290_v17 = vsub.f32 %v3897_v57, %v2272_v56  ;;  %v2466_v47 = vld [vmem:[%s3966_s6] ss:$0 sm:$0xff] }
 0x4c3   :  { %v2276_v3 = vadd.f32 1e-05, %v2275_v28  ;;  %v2291_v1 = vsub.f32 %v3913_v7, %v2272_v56  ;;  %v2292_v19 = vsub.f32 %v3911_v6, %v2272_v56  ;;  %v2294_v9 = vsub.f32 %v3925_v22, %v2272_v56 }
 0x4c5   :  { %2638 = vrsqrt.f32 %v2276_v3 }
 0x4cf   :  { %v2639_v32 = vpop.eup %2638 }
 0x4d0   :  { %v2278_v33 = vmul.f32 %v2639_v32, %v2180_v18 }
 0x4d2   :  { %v2298_v46 = vrot.slane %v2278_v33, %v1143_v52 }
 0x4d4   :  { %v2313_v57 = vmul.f32 %v2298_v46, %v2293_v61  ;;  %v2299_v60 = vmul.f32 %v2298_v46, %v2279_v5  ;;  %v2300_v7 = vmul.f32 %v2298_v46, %v2280_v4  ;;  %v2301_v6 = vmul.f32 %v2298_v46, %v2281_v2 }
 0x4d5   :  { %v2302_v10 = vmul.f32 %v2298_v46, %v2282_v16  ;;  %v2303_v11 = vmul.f32 %v2298_v46, %v2283_v41  ;;  %v2304_v12 = vmul.f32 %v2298_v46, %v2284_v40  ;;  %v2305_v13 = vmul.f32 %v2298_v46, %v2285_v53 }
 0x4d6   :  { %v2321_v14 = vadd.f32 %v2466_v47, %v2299_v60  ;;  %v2306_v15 = vmul.f32 %v2298_v46, %v2286_v63  ;;  %v2322_v21 = vadd.f32 %v2466_v47, %v2300_v7  ;;  %v2307_v22 = vmul.f32 %v2298_v46, %v2287_v0 }
 0x4d7   :  { %v2308_v62 = vmul.f32 %v2298_v46, %v2288_v8  ;;  %v2309_v52 = vmul.f32 %v2298_v46, %v2289_v29  ;;  %v2310_v23 = vmul.f32 %v2298_v46, %v2290_v17  ;;  %v2311_v24 = vmul.f32 %v2298_v46, %v2291_v1 }
 0x4d8   :  { %v2337_v20 = vmax.f32 %v2321_v14, 0.0  ;;  %v2312_v25 = vmul.f32 %v2298_v46, %v2292_v19  ;;  %v2338_v26 = vmax.f32 %v2322_v21, 0.0  ;;  %v2323_v27 = vadd.f32 %v2466_v47, %v2301_v6 }
 0x4d9   :  { %v2314_v30 = vmul.f32 %v2298_v46, %v2294_v9  ;;  %v2324_v34 = vadd.f32 %v2466_v47, %v2302_v10  ;;  %v2325_v36 = vadd.f32 %v2466_v47, %v2303_v11  ;;  %v2326_v38 = vadd.f32 %v2466_v47, %v2304_v12 }
 0x4da   :  { %2353 = vxpose.xlu0.b32.start [1/16] (narrow) %v2337_v20, 8  ;;  %v2339_v31 = vmax.f32 %v2323_v27, 0.0  ;;  %v2327_v42 = vadd.f32 %v2466_v47, %v2305_v13  ;;  %v2328_v44 = vadd.f32 %v2466_v47, %v2306_v15  ;;  %v2329_v48 = vadd.f32 %v2466_v47, %v2307_v22 }
 0x4db   :  { %v2340_v35 = vmax.f32 %v2324_v34, 0.0  ;;  %v2341_v37 = vmax.f32 %v2325_v36, 0.0  ;;  %v2342_v39 = vmax.f32 %v2326_v38, 0.0  ;;  %v2330_v50 = vadd.f32 %v2466_v47, %v2308_v62 }
 0x4dc   :  { %v2343_v43 = vmax.f32 %v2327_v42, 0.0  ;;  %v2344_v45 = vmax.f32 %v2328_v44, 0.0  ;;  %v2345_v49 = vmax.f32 %v2329_v48, 0.0  ;;  %v2331_v54 = vadd.f32 %v2466_v47, %v2309_v52 }
 0x4dd   :  { %v2346_v51 = vmax.f32 %v2330_v50, 0.0  ;;  %v2332_v56 = vadd.f32 %v2466_v47, %v2310_v23  ;;  %v2333_v59 = vadd.f32 %v2466_v47, %v2311_v24  ;;  %v2334_v5 = vadd.f32 %v2466_v47, %v2312_v25 }
 0x4de   :  { %2354 = vxpose.xlu0.b32.cont [2/16] (narrow) %v2338_v26, 8  ;;  %v2347_v55 = vmax.f32 %v2331_v54, 0.0  ;;  %v2335_v2 = vadd.f32 %v2466_v47, %v2313_v57  ;;  %v2336_v41 = vadd.f32 %v2466_v47, %v2314_v30 }
 0x4df   :  { %v2348_v58 = vmax.f32 %v2332_v56, 0.0  ;;  %v2349_v61 = vmax.f32 %v2333_v59, 0.0  ;;  %v2350_v4 = vmax.f32 %v2334_v5, 0.0 }
 0x4e0   :  { %v2351_v16 = vmax.f32 %v2335_v2, 0.0  ;;  %v2352_v28 = vmax.f32 %v2336_v41, 0.0 }
 0x4e2   :  { %2355 = vxpose.xlu0.b32.cont [3/16] (narrow) %v2339_v31, 8 }
 0x4e6   :  { %2356 = vxpose.xlu0.b32.cont [4/16] (narrow) %v2340_v35, 8 }
 0x4ea   :  { %2357 = vxpose.xlu0.b32.cont [5/16] (narrow) %v2341_v37, 8 }
 0x4ee   :  { %2358 = vxpose.xlu0.b32.cont [6/16] (narrow) %v2342_v39, 8 }
 0x4f2   :  { %2359 = vxpose.xlu0.b32.cont [7/16] (narrow) %v2343_v43, 8 }
 0x4f6   :  { %2360 = vxpose.xlu0.b32.cont [8/16] (narrow) %v2344_v45, 8 }
 0x4fa   :  { %2361 = vxpose.xlu0.b32.cont [9/16] (narrow) %v2345_v49, 8 }
 0x4fe   :  { %2362 = vxpose.xlu0.b32.cont [10/16] (narrow) %v2346_v51, 8 }
 0x502   :  { %2363 = vxpose.xlu0.b32.cont [11/16] (narrow) %v2347_v55, 8 }
 0x506   :  { %2364 = vxpose.xlu0.b32.cont [12/16] (narrow) %v2348_v58, 8 }
 0x50a   :  { %2365 = vxpose.xlu0.b32.cont [13/16] (narrow) %v2349_v61, 8 }
 0x50e   :  { %2366 = vxpose.xlu0.b32.cont [14/16] (narrow) %v2350_v4, 8 }
 0x512   :  { %2367 = vxpose.xlu0.b32.cont [15/16] (narrow) %v2351_v16, 8 }
 0x516   :  { %2368 = vxpose.xlu0.b32.end [16/16] (narrow) %v2352_v28, 8 }
 0x55a   :  { %v2369_v40 = vpop.trf.xlu0 }
 0x55b   :  { %2385 = vst [vmem:[%s3967_s7] sm:$0xff] %v2369_v40 }

</bundles_post_ra>
